<compile_context>
chip_gen: v7x
topology: tpu7x:2x2x1
jax: 0.10.0
libtpu: 0.0.40
codegen_flags: <defaults>
</compile_context>

<pallas_src>
import functools

import jax
import jax.numpy as jnp
import numpy as np
from jax import lax
from jax.experimental import pallas as pl
from jax.experimental.pallas import tpu as pltpu


# ----------------------------- Pallas kernel ------------------------------- #

def _skconv_kernel(M, B, H, W, C, P, x_ref, *refs):
    # refs = (w_mat_0 .. w_mat_{M-1}, bn_scale, bn_bias, w_fc, b_fc,
    #         w_fcs, b_fcs, o_ref, p_ref[scratch])
    w_refs = refs[:M]
    (scale_ref, bias_ref, w_fc_ref, b_fc_ref,
     w_fcs_ref, b_fcs_ref, o_ref, p_ref) = refs[M:]

    N = B * H * W
    x = x_ref[...]                                    # (B, Hp, Wp, C)  bf16

    # ---- branch convs: im2col into VMEM scratch + ONE MXU matmul per branch,
    #      then folded BatchNorm (inference form) + ReLU, all in f32 ----
    feas3 = []
    for i in range(M):
        k = 2 * i + 1                                 # kernel size of branch i
        off = P - i                                   # align branch pad inside max pad
        idx = 0
        for kh in range(k):
            for kw in range(k):
                t = x[:, kh + off:kh + off + H, kw + off:kw + off + W, :]  # (B,H,W,C)
                # collapse leading dims only (minor dim C unchanged -> no relayout)
                p_ref[:, idx * C:(idx + 1) * C] = t.reshape(N, C)
                idx += 1
        patches = p_ref[:, :k * k * C]                # (N, k*k*C) bf16
        f = lax.dot_general(                          # (N, C) f32, single big-K matmul
            patches, w_refs[i][...],
            dimension_numbers=(((1,), (0,)), ((), ())),
            preferred_element_type=jnp.float32)
        scale = scale_ref[i][None, :]                 # (1, C)
        bias = bias_ref[i][None, :]
        fea = jnp.maximum(f * scale + bias, 0.0)      # (N, C) f32
        feas3.append(fea.reshape(B, H * W, C))        # leading-dim split, no relayout

    # ---- fea_U = sum over branches, global average pool per image ----
    fea_U = feas3[0]
    for i in range(1, M):
        fea_U = fea_U + feas3[i]                      # (B, H*W, C)
    fea_s = jnp.mean(fea_U, axis=1)                   # (B, C)

    # ---- squeeze FC + excitation FCs (tiny, kept in f32) ----
    fea_z = jnp.dot(fea_s, w_fc_ref[...],
                    preferred_element_type=jnp.float32) + b_fc_ref[...]     # (B, d)
    logits = []
    for i in range(M):
        l = jnp.dot(fea_z, w_fcs_ref[i],
                    preferred_element_type=jnp.float32) + b_fcs_ref[i][None, :]
        logits.append(l)                              # (B, C)

    # ---- softmax over the M branches ----
    m = logits[0]
    for i in range(1, M):
        m = jnp.maximum(m, logits[i])
    exps = [jnp.exp(l - m) for l in logits]
    denom = exps[0]
    for i in range(1, M):
        denom = denom + exps[i]
    inv = pl.reciprocal(denom, approx=True)           # EUP slot, (B, C)

    # ---- attention-weighted fusion ----
    out = feas3[0] * (exps[0] * inv)[:, None, :]
    for i in range(1, M):
        out = out + feas3[i] * (exps[i] * inv)[:, None, :]

    o_ref[...] = out.astype(o_ref.dtype)              # (B, H*W, C)


# ----------------------------- Wrapper / glue ------------------------------ #

def skconv_pallas(x_nchw, params, M):
    """x_nchw: (B, C, H, W) float32.  Returns (B, C, H, W) float32."""
    B, C, H, W = x_nchw.shape
    P = M - 1                                         # max padding over branches
    Hp, Wp = H + 2 * P, W + 2 * P
    N = B * H * W
    kmax = 2 * M - 1
    d = params["w_fc"].shape[1]

    # NHWC, bf16 operands for the conv matmuls, spatial zero-pad once.
    x = jnp.transpose(x_nchw, (0, 2, 3, 1)).astype(jnp.bfloat16)
    x_pad = jnp.pad(x, ((0, 0), (P, P), (P, P), (0, 0)))

    # conv weights reshaped (at trace time, free) to im2col matrices (k*k*C, C)
    w_mats = [params["conv_w"][i].reshape((2 * i + 1) ** 2 * C, C) for i in range(M)]

    def full(shape):
        nd = len(shape)
        return pl.BlockSpec(shape, lambda _, nd=nd: (0,) * nd)

    in_specs = [full((B, Hp, Wp, C))]
    in_specs += [full(w.shape) for w in w_mats]
    in_specs += [
        full((M, C)),            # bn_scale
        full((M, C)),            # bn_bias
        full((C, d)),            # w_fc
        full((1, d)),            # b_fc
        full((M, d, C)),         # w_fcs
        full((M, C)),            # b_fcs
    ]

    kernel = functools.partial(_skconv_kernel, M, B, H, W, C, P)
    out = pl.pallas_call(
        kernel,
        out_shape=jax.ShapeDtypeStruct((B, H * W, C), jnp.float32),
        grid=(1,),                                   # whole batch in one step
        in_specs=in_specs,
        out_specs=full((B, H * W, C)),
        scratch_shapes=[pltpu.VMEM((N, kmax * kmax * C), jnp.bfloat16)],
        compiler_params=pltpu.CompilerParams(
            dimension_semantics=("arbitrary",)),
    )(x_pad, *w_mats, params["bn_scale"], params["bn_bias"],
      params["w_fc"], params["b_fc"], params["w_fcs"], params["b_fcs"])

    return jnp.transpose(out.reshape(B, H, W, C), (0, 3, 1, 2))   # back to NCHW


# ------------------------- Deterministic parameters ------------------------ #

def init_skconv_params(key, C, M, G, r, L=32):
    d = max(int(C / r), L)
    cg = C // G
    eps = 1e-5
    keys = jax.random.split(key, 4 * M + 4)
    ki = 0

    conv_w, bn_scale, bn_bias = [], [], []
    for i in range(M):
        k = 1 + 2 * i
        wg = jax.random.normal(keys[ki], (C, cg, k, k), jnp.float32) \
            * (1.0 / (cg * k * k) ** 0.5); ki += 1          # torch (Cout, Cin/G, k, k)
        cb = 0.1 * jax.random.normal(keys[ki], (C,), jnp.float32); ki += 1
        gamma = 1.0 + 0.1 * jax.random.normal(keys[ki], (C,), jnp.float32); ki += 1
        beta = 0.1 * jax.random.normal(keys[ki], (C,), jnp.float32); ki += 1
        mean = jnp.zeros((C,), jnp.float32)                  # BN inference-form fold
        var = jnp.ones((C,), jnp.float32)
        scale = gamma / jnp.sqrt(var + eps)
        bias = (cb - mean) * scale + beta

        # grouped conv weight -> dense block-diagonal HWIO weight (exact groups=G)
        w_dense = jnp.zeros((k, k, C, C), jnp.float32)
        for g in range(G):
            blk = wg[g * cg:(g + 1) * cg]                    # (cg_out, cg_in, k, k)
            w_dense = w_dense.at[:, :, g * cg:(g + 1) * cg, g * cg:(g + 1) * cg].set(
                jnp.transpose(blk, (2, 3, 1, 0)))            # -> (k, k, cin, cout)
        conv_w.append(w_dense.astype(jnp.bfloat16))          # bf16 MXU operands
        bn_scale.append(scale)
        bn_bias.append(bias)

    w_fc = jax.random.normal(keys[ki], (C, d), jnp.float32) * (1.0 / C ** 0.5); ki += 1
    b_fc = 0.1 * jax.random.normal(keys[ki], (1, d), jnp.float32); ki += 1
    w_fcs = jax.random.normal(keys[ki], (M, d, C), jnp.float32) * (1.0 / d ** 0.5); ki += 1
    b_fcs = 0.1 * jax.random.normal(keys[ki], (M, C), jnp.float32); ki += 1

    return {
        "conv_w": conv_w,                # list of (k,k,C,C) bf16 dense HWIO
        "bn_scale": jnp.stack(bn_scale),
        "bn_bias": jnp.stack(bn_bias),
        "w_fc": w_fc, "b_fc": b_fc,
        "w_fcs": w_fcs, "b_fcs": b_fcs,
    }


# ----------------------------- Pure-JAX reference -------------------------- #

def skconv_reference(x_nchw, params, M):
    # Consumes the exact same bf16-quantized x / conv weights as the kernel,
    # upcast to f32, so the only differences are accumulation order and the
    # approximate reciprocal in the kernel's softmax.
    x = jnp.transpose(x_nchw, (0, 2, 3, 1)).astype(jnp.bfloat16).astype(jnp.float32)
    hi = lax.Precision.HIGHEST
    feas = []
    for i in range(M):
        w = params["conv_w"][i].astype(jnp.float32)
        y = lax.conv_general_dilated(
            x, w, window_strides=(1, 1), padding=[(i, i), (i, i)],
            dimension_numbers=("NHWC", "HWIO", "NHWC"), precision=hi)
        y = y * params["bn_scale"][i][None, None, None, :] \
            + params["bn_bias"][i][None, None, None, :]
        feas.append(jnp.maximum(y, 0.0))
    feas = jnp.stack(feas, axis=1)                           # (B, M, H, W, C)
    fea_U = feas.sum(axis=1)
    fea_s = fea_U.mean(axis=(1, 2))                          # (B, C)
    fea_z = jnp.dot(fea_s, params["w_fc"], precision=hi) + params["b_fc"]
    logits = jnp.stack(
        [jnp.dot(fea_z, params["w_fcs"][i], precision=hi) + params["b_fcs"][i]
         for i in range(M)], axis=1)                         # (B, M, C)
    att = jax.nn.softmax(logits, axis=1)
    out = (feas * att[:, :, None, None, :]).sum(axis=1)      # (B, H, W, C)
    return jnp.transpose(out, (0, 3, 1, 2))                  # NCHW


# ----------------------------------- Main ----------------------------------- #

if __name__ == "__main__":
    # SKConv(features=64, M=2, G=8, r=2, L=32) -> d = 32  (same config as the
    # previously reviewed version, for comparability)
    B, C, H, W = 2, 64, 8, 8
    M, G, r = 2, 8, 2

    key = jax.random.PRNGKey(0)
    kx, kp = jax.random.split(key)
    x = jax.random.normal(kx, (B, C, H, W), jnp.float32)
    params = init_skconv_params(kp, C, M, G, r)

    out = jax.block_until_ready(skconv_pallas(x, params, M))
    ref = jax.block_until_ready(skconv_reference(x, params, M))

    # bf16 conv operands + approximate softmax reciprocal set the tolerance.
    np.testing.assert_allclose(np.asarray(out), np.asarray(ref),
                               rtol=1e-2, atol=1e-2)

    print("KERNEL_OK")
</pallas_src>

<mosaic_0001>
module attributes {stable_mosaic.version = 11 : i64} {
  func.func @_skconv_kernel(%arg0: i32, %arg1: memref<2x10x10x64xbf16, #tpu.memory_space<vmem>>, %arg2: memref<64x64xbf16, #tpu.memory_space<vmem>>, %arg3: memref<576x64xbf16, #tpu.memory_space<vmem>>, %arg4: memref<2x64xf32, #tpu.memory_space<vmem>>, %arg5: memref<2x64xf32, #tpu.memory_space<vmem>>, %arg6: memref<64x32xf32, #tpu.memory_space<vmem>>, %arg7: memref<1x32xf32, #tpu.memory_space<vmem>>, %arg8: memref<2x32x64xf32, #tpu.memory_space<vmem>>, %arg9: memref<2x64xf32, #tpu.memory_space<vmem>>, %arg10: memref<2x64x64xf32, #tpu.memory_space<vmem>>, %arg11: memref<128x576xbf16, #tpu.memory_space<vmem>>) attributes {dimension_semantics = [#tpu.dimension_semantics<arbitrary>], iteration_bounds = array<i64: 1>, scalar_prefetch = 0 : i64, scratch_operands = 1 : i64, tpu.core_type = #tpu.core_type<tc>, window_params = [{pipeline_mode = #tpu.pipeline_mode<synchronous>, transform_indices = @transform_0, window_bounds = array<i64: 2, 10, 10, 64>}, {pipeline_mode = #tpu.pipeline_mode<synchronous>, transform_indices = @transform_1, window_bounds = array<i64: 64, 64>}, {pipeline_mode = #tpu.pipeline_mode<synchronous>, transform_indices = @transform_2, window_bounds = array<i64: 576, 64>}, {pipeline_mode = #tpu.pipeline_mode<synchronous>, transform_indices = @transform_3, window_bounds = array<i64: 2, 64>}, {pipeline_mode = #tpu.pipeline_mode<synchronous>, transform_indices = @transform_4, window_bounds = array<i64: 2, 64>}, {pipeline_mode = #tpu.pipeline_mode<synchronous>, transform_indices = @transform_5, window_bounds = array<i64: 64, 32>}, {pipeline_mode = #tpu.pipeline_mode<synchronous>, transform_indices = @transform_6, window_bounds = array<i64: 1, 32>}, {pipeline_mode = #tpu.pipeline_mode<synchronous>, transform_indices = @transform_7, window_bounds = array<i64: 2, 32, 64>}, {pipeline_mode = #tpu.pipeline_mode<synchronous>, transform_indices = @transform_8, window_bounds = array<i64: 2, 64>}, {pipeline_mode = #tpu.pipeline_mode<synchronous>, transform_indices = @transform_9, window_bounds = array<i64: 2, 64, 64>}]} {
    %c0 = arith.constant 0 : index
    %c0_0 = arith.constant 0 : index
    %c0_1 = arith.constant 0 : index
    %c0_2 = arith.constant 0 : index
    %0 = vector.load %arg1[%c0, %c0_0, %c0_1, %c0_2] : memref<2x10x10x64xbf16, #tpu.memory_space<vmem>>, vector<2x10x10x64xbf16>
    %1 = vector.extract_strided_slice %0 {offsets = [0, 1, 1, 0], sizes = [2, 8, 8, 64], strides = [1, 1, 1, 1]} : vector<2x10x10x64xbf16> to vector<2x8x8x64xbf16>
    %2 = vector.shape_cast %1 : vector<2x8x8x64xbf16> to vector<128x64xbf16>
    %c0_3 = arith.constant 0 : index
    %c0_4 = arith.constant 0 : index
    %3 = vector.load %arg11[%c0_3, %c0_4] : memref<128x576xbf16, #tpu.memory_space<vmem>>, vector<128x64xbf16>
    tpu.vector_store %arg11[%c0_3, %c0_4], %2 {strides = array<i32>} : memref<128x576xbf16, #tpu.memory_space<vmem>>, vector<128x64xbf16>,
    %c0_5 = arith.constant 0 : index
    %c0_6 = arith.constant 0 : index
    %4 = vector.load %arg11[%c0_5, %c0_6] : memref<128x576xbf16, #tpu.memory_space<vmem>>, vector<128x64xbf16>
    %c0_7 = arith.constant 0 : index
    %c0_8 = arith.constant 0 : index
    %5 = vector.load %arg2[%c0_7, %c0_8] : memref<64x64xbf16, #tpu.memory_space<vmem>>, vector<64x64xbf16>
    %cst = arith.constant dense<0.000000e+00> : vector<128x64xf32>
    %6 = tpu.matmul %4, %5, %cst {dimension_numbers = #tpu.dot_dimension_numbers<[1], [0], [0], [1], [0, 0, 1, 1], [], []>} : vector<128x64xbf16>, vector<64x64xbf16>, vector<128x64xf32> -> vector<128x64xf32>
    %c0_9 = arith.constant 0 : index
    %c0_10 = arith.constant 0 : index
    %7 = vector.load %arg4[%c0_9, %c0_10] : memref<2x64xf32, #tpu.memory_space<vmem>>, vector<1x64xf32>
    %8 = vector.shape_cast %7 : vector<1x64xf32> to vector<64xf32>
    %9 = vector.shape_cast %8 : vector<64xf32> to vector<1x64xf32>
    %c0_11 = arith.constant 0 : index
    %c0_12 = arith.constant 0 : index
    %10 = vector.load %arg5[%c0_11, %c0_12] : memref<2x64xf32, #tpu.memory_space<vmem>>, vector<1x64xf32>
    %11 = vector.shape_cast %10 : vector<1x64xf32> to vector<64xf32>
    %12 = vector.shape_cast %11 : vector<64xf32> to vector<1x64xf32>
    %13 = vector.broadcast %9 : vector<1x64xf32> to vector<128x64xf32>
    %14 = arith.mulf %6, %13 : vector<128x64xf32>
    %15 = vector.broadcast %12 : vector<1x64xf32> to vector<128x64xf32>
    %16 = arith.addf %14, %15 : vector<128x64xf32>
    %cst_13 = arith.constant 0.000000e+00 : f32
    %17 = vector.broadcast %cst_13 : f32 to vector<128x64xf32>
    %18 = arith.maximumf %16, %17 : vector<128x64xf32>
    %19 = vector.shape_cast %18 : vector<128x64xf32> to vector<2x64x64xf32>
    %20 = vector.extract_strided_slice %0 {offsets = [0, 0, 0, 0], sizes = [2, 8, 8, 64], strides = [1, 1, 1, 1]} : vector<2x10x10x64xbf16> to vector<2x8x8x64xbf16>
    %21 = vector.shape_cast %20 : vector<2x8x8x64xbf16> to vector<128x64xbf16>
    %c0_14 = arith.constant 0 : index
    %c0_15 = arith.constant 0 : index
    %22 = vector.load %arg11[%c0_14, %c0_15] : memref<128x576xbf16, #tpu.memory_space<vmem>>, vector<128x64xbf16>
    tpu.vector_store %arg11[%c0_14, %c0_15], %21 {strides = array<i32>} : memref<128x576xbf16, #tpu.memory_space<vmem>>, vector<128x64xbf16>,
    %23 = vector.extract_strided_slice %0 {offsets = [0, 0, 1, 0], sizes = [2, 8, 8, 64], strides = [1, 1, 1, 1]} : vector<2x10x10x64xbf16> to vector<2x8x8x64xbf16>
    %24 = vector.shape_cast %23 : vector<2x8x8x64xbf16> to vector<128x64xbf16>
    %c0_16 = arith.constant 0 : index
    %c64 = arith.constant 64 : index
    %25 = vector.load %arg11[%c0_16, %c64] : memref<128x576xbf16, #tpu.memory_space<vmem>>, vector<128x64xbf16>
    tpu.vector_store %arg11[%c0_16, %c64], %24 {strides = array<i32>} : memref<128x576xbf16, #tpu.memory_space<vmem>>, vector<128x64xbf16>,
    %26 = vector.extract_strided_slice %0 {offsets = [0, 0, 2, 0], sizes = [2, 8, 8, 64], strides = [1, 1, 1, 1]} : vector<2x10x10x64xbf16> to vector<2x8x8x64xbf16>
    %27 = vector.shape_cast %26 : vector<2x8x8x64xbf16> to vector<128x64xbf16>
    %c0_17 = arith.constant 0 : index
    %c128 = arith.constant 128 : index
    %28 = vector.load %arg11[%c0_17, %c128] : memref<128x576xbf16, #tpu.memory_space<vmem>>, vector<128x64xbf16>
    tpu.vector_store %arg11[%c0_17, %c128], %27 {strides = array<i32>} : memref<128x576xbf16, #tpu.memory_space<vmem>>, vector<128x64xbf16>,
    %29 = vector.extract_strided_slice %0 {offsets = [0, 1, 0, 0], sizes = [2, 8, 8, 64], strides = [1, 1, 1, 1]} : vector<2x10x10x64xbf16> to vector<2x8x8x64xbf16>
    %30 = vector.shape_cast %29 : vector<2x8x8x64xbf16> to vector<128x64xbf16>
    %c0_18 = arith.constant 0 : index
    %c192 = arith.constant 192 : index
    %31 = vector.load %arg11[%c0_18, %c192] : memref<128x576xbf16, #tpu.memory_space<vmem>>, vector<128x64xbf16>
    tpu.vector_store %arg11[%c0_18, %c192], %30 {strides = array<i32>} : memref<128x576xbf16, #tpu.memory_space<vmem>>, vector<128x64xbf16>,
    %32 = vector.extract_strided_slice %0 {offsets = [0, 1, 1, 0], sizes = [2, 8, 8, 64], strides = [1, 1, 1, 1]} : vector<2x10x10x64xbf16> to vector<2x8x8x64xbf16>
    %33 = vector.shape_cast %32 : vector<2x8x8x64xbf16> to vector<128x64xbf16>
    %c0_19 = arith.constant 0 : index
    %c256 = arith.constant 256 : index
    %34 = vector.load %arg11[%c0_19, %c256] : memref<128x576xbf16, #tpu.memory_space<vmem>>, vector<128x64xbf16>
    tpu.vector_store %arg11[%c0_19, %c256], %33 {strides = array<i32>} : memref<128x576xbf16, #tpu.memory_space<vmem>>, vector<128x64xbf16>,
    %35 = vector.extract_strided_slice %0 {offsets = [0, 1, 2, 0], sizes = [2, 8, 8, 64], strides = [1, 1, 1, 1]} : vector<2x10x10x64xbf16> to vector<2x8x8x64xbf16>
    %36 = vector.shape_cast %35 : vector<2x8x8x64xbf16> to vector<128x64xbf16>
    %c0_20 = arith.constant 0 : index
    %c320 = arith.constant 320 : index
    %37 = vector.load %arg11[%c0_20, %c320] : memref<128x576xbf16, #tpu.memory_space<vmem>>, vector<128x64xbf16>
    tpu.vector_store %arg11[%c0_20, %c320], %36 {strides = array<i32>} : memref<128x576xbf16, #tpu.memory_space<vmem>>, vector<128x64xbf16>,
    %38 = vector.extract_strided_slice %0 {offsets = [0, 2, 0, 0], sizes = [2, 8, 8, 64], strides = [1, 1, 1, 1]} : vector<2x10x10x64xbf16> to vector<2x8x8x64xbf16>
    %39 = vector.shape_cast %38 : vector<2x8x8x64xbf16> to vector<128x64xbf16>
    %c0_21 = arith.constant 0 : index
    %c384 = arith.constant 384 : index
    %40 = vector.load %arg11[%c0_21, %c384] : memref<128x576xbf16, #tpu.memory_space<vmem>>, vector<128x64xbf16>
    tpu.vector_store %arg11[%c0_21, %c384], %39 {strides = array<i32>} : memref<128x576xbf16, #tpu.memory_space<vmem>>, vector<128x64xbf16>,
    %41 = vector.extract_strided_slice %0 {offsets = [0, 2, 1, 0], sizes = [2, 8, 8, 64], strides = [1, 1, 1, 1]} : vector<2x10x10x64xbf16> to vector<2x8x8x64xbf16>
    %42 = vector.shape_cast %41 : vector<2x8x8x64xbf16> to vector<128x64xbf16>
    %c0_22 = arith.constant 0 : index
    %c448 = arith.constant 448 : index
    %43 = vector.load %arg11[%c0_22, %c448] : memref<128x576xbf16, #tpu.memory_space<vmem>>, vector<128x64xbf16>
    tpu.vector_store %arg11[%c0_22, %c448], %42 {strides = array<i32>} : memref<128x576xbf16, #tpu.memory_space<vmem>>, vector<128x64xbf16>,
    %44 = vector.extract_strided_slice %0 {offsets = [0, 2, 2, 0], sizes = [2, 8, 8, 64], strides = [1, 1, 1, 1]} : vector<2x10x10x64xbf16> to vector<2x8x8x64xbf16>
    %45 = vector.shape_cast %44 : vector<2x8x8x64xbf16> to vector<128x64xbf16>
    %c0_23 = arith.constant 0 : index
    %c512 = arith.constant 512 : index
    %46 = vector.load %arg11[%c0_23, %c512] : memref<128x576xbf16, #tpu.memory_space<vmem>>, vector<128x64xbf16>
    tpu.vector_store %arg11[%c0_23, %c512], %45 {strides = array<i32>} : memref<128x576xbf16, #tpu.memory_space<vmem>>, vector<128x64xbf16>,
    %c0_24 = arith.constant 0 : index
    %c0_25 = arith.constant 0 : index
    %47 = vector.load %arg11[%c0_24, %c0_25] : memref<128x576xbf16, #tpu.memory_space<vmem>>, vector<128x576xbf16>
    %c0_26 = arith.constant 0 : index
    %c0_27 = arith.constant 0 : index
    %48 = vector.load %arg3[%c0_26, %c0_27] : memref<576x64xbf16, #tpu.memory_space<vmem>>, vector<576x64xbf16>
    %cst_28 = arith.constant dense<0.000000e+00> : vector<128x64xf32>
    %49 = tpu.matmul %47, %48, %cst_28 {dimension_numbers = #tpu.dot_dimension_numbers<[1], [0], [0], [1], [0, 0, 1, 1], [], []>} : vector<128x576xbf16>, vector<576x64xbf16>, vector<128x64xf32> -> vector<128x64xf32>
    %c1 = arith.constant 1 : index
    %c0_29 = arith.constant 0 : index
    %50 = vector.load %arg4[%c1, %c0_29] : memref<2x64xf32, #tpu.memory_space<vmem>>, vector<1x64xf32>
    %51 = vector.shape_cast %50 : vector<1x64xf32> to vector<64xf32>
    %52 = vector.shape_cast %51 : vector<64xf32> to vector<1x64xf32>
    %c1_30 = arith.constant 1 : index
    %c0_31 = arith.constant 0 : index
    %53 = vector.load %arg5[%c1_30, %c0_31] : memref<2x64xf32, #tpu.memory_space<vmem>>, vector<1x64xf32>
    %54 = vector.shape_cast %53 : vector<1x64xf32> to vector<64xf32>
    %55 = vector.shape_cast %54 : vector<64xf32> to vector<1x64xf32>
    %56 = vector.broadcast %52 : vector<1x64xf32> to vector<128x64xf32>
    %57 = arith.mulf %49, %56 : vector<128x64xf32>
    %58 = vector.broadcast %55 : vector<1x64xf32> to vector<128x64xf32>
    %59 = arith.addf %57, %58 : vector<128x64xf32>
    %cst_32 = arith.constant 0.000000e+00 : f32
    %60 = vector.broadcast %cst_32 : f32 to vector<128x64xf32>
    %61 = arith.maximumf %59, %60 : vector<128x64xf32>
    %62 = vector.shape_cast %61 : vector<128x64xf32> to vector<2x64x64xf32>
    %63 = arith.addf %19, %62 : vector<2x64x64xf32>
    %cst_33 = arith.constant dense<0.000000e+00> : vector<2x64xf32>
    %64 = vector.multi_reduction <add>, %63, %cst_33 [1] : vector<2x64x64xf32> to vector<2x64xf32>
    %cst_34 = arith.constant 6.400000e+01 : f32
    %65 = vector.broadcast %cst_34 : f32 to vector<2x64xf32>
    %66 = arith.divf %64, %65 : vector<2x64xf32>
    %c0_35 = arith.constant 0 : index
    %c0_36 = arith.constant 0 : index
    %67 = vector.load %arg6[%c0_35, %c0_36] : memref<64x32xf32, #tpu.memory_space<vmem>>, vector<64x32xf32>
    %cst_37 = arith.constant dense<0.000000e+00> : vector<2x32xf32>
    %68 = tpu.matmul %66, %67, %cst_37 {dimension_numbers = #tpu.dot_dimension_numbers<[1], [0], [0], [1], [0, 0, 1, 1], [], []>} : vector<2x64xf32>, vector<64x32xf32>, vector<2x32xf32> -> vector<2x32xf32>
    %c0_38 = arith.constant 0 : index
    %c0_39 = arith.constant 0 : index
    %69 = vector.load %arg7[%c0_38, %c0_39] : memref<1x32xf32, #tpu.memory_space<vmem>>, vector<1x32xf32>
    %70 = vector.broadcast %69 : vector<1x32xf32> to vector<2x32xf32>
    %71 = arith.addf %68, %70 : vector<2x32xf32>
    %c0_40 = arith.constant 0 : index
    %c0_41 = arith.constant 0 : index
    %c0_42 = arith.constant 0 : index
    %72 = vector.load %arg8[%c0_40, %c0_41, %c0_42] : memref<2x32x64xf32, #tpu.memory_space<vmem>>, vector<1x32x64xf32>
    %73 = vector.shape_cast %72 : vector<1x32x64xf32> to vector<32x64xf32>
    %cst_43 = arith.constant dense<0.000000e+00> : vector<2x64xf32>
    %74 = tpu.matmul %71, %73, %cst_43 {dimension_numbers = #tpu.dot_dimension_numbers<[1], [0], [0], [1], [0, 0, 1, 1], [], []>} : vector<2x32xf32>, vector<32x64xf32>, vector<2x64xf32> -> vector<2x64xf32>
    %c0_44 = arith.constant 0 : index
    %c0_45 = arith.constant 0 : index
    %75 = vector.load %arg9[%c0_44, %c0_45] : memref<2x64xf32, #tpu.memory_space<vmem>>, vector<1x64xf32>
    %76 = vector.shape_cast %75 : vector<1x64xf32> to vector<64xf32>
    %77 = vector.shape_cast %76 : vector<64xf32> to vector<1x64xf32>
    %78 = vector.broadcast %77 : vector<1x64xf32> to vector<2x64xf32>
    %79 = arith.addf %74, %78 : vector<2x64xf32>
    %c1_46 = arith.constant 1 : index
    %c0_47 = arith.constant 0 : index
    %c0_48 = arith.constant 0 : index
    %80 = vector.load %arg8[%c1_46, %c0_47, %c0_48] : memref<2x32x64xf32, #tpu.memory_space<vmem>>, vector<1x32x64xf32>
    %81 = vector.shape_cast %80 : vector<1x32x64xf32> to vector<32x64xf32>
    %cst_49 = arith.constant dense<0.000000e+00> : vector<2x64xf32>
    %82 = tpu.matmul %71, %81, %cst_49 {dimension_numbers = #tpu.dot_dimension_numbers<[1], [0], [0], [1], [0, 0, 1, 1], [], []>} : vector<2x32xf32>, vector<32x64xf32>, vector<2x64xf32> -> vector<2x64xf32>
    %c1_50 = arith.constant 1 : index
    %c0_51 = arith.constant 0 : index
    %83 = vector.load %arg9[%c1_50, %c0_51] : memref<2x64xf32, #tpu.memory_space<vmem>>, vector<1x64xf32>
    %84 = vector.shape_cast %83 : vector<1x64xf32> to vector<64xf32>
    %85 = vector.shape_cast %84 : vector<64xf32> to vector<1x64xf32>
    %86 = vector.broadcast %85 : vector<1x64xf32> to vector<2x64xf32>
    %87 = arith.addf %82, %86 : vector<2x64xf32>
    %88 = arith.maximumf %79, %87 : vector<2x64xf32>
    %89 = arith.subf %79, %88 : vector<2x64xf32>
    %90 = math.exp %89 : vector<2x64xf32>
    %91 = arith.subf %87, %88 : vector<2x64xf32>
    %92 = math.exp %91 : vector<2x64xf32>
    %93 = arith.addf %90, %92 : vector<2x64xf32>
    %94 = tpu.reciprocal %93 {approx = true} : vector<2x64xf32> -> vector<2x64xf32>
    %95 = arith.mulf %90, %94 : vector<2x64xf32>
    %96 = vector.shape_cast %95 : vector<2x64xf32> to vector<2x1x64xf32>
    %97 = vector.broadcast %96 : vector<2x1x64xf32> to vector<2x64x64xf32>
    %98 = arith.mulf %19, %97 : vector<2x64x64xf32>
    %99 = arith.mulf %92, %94 : vector<2x64xf32>
    %100 = vector.shape_cast %99 : vector<2x64xf32> to vector<2x1x64xf32>
    %101 = vector.broadcast %100 : vector<2x1x64xf32> to vector<2x64x64xf32>
    %102 = arith.mulf %62, %101 : vector<2x64x64xf32>
    %103 = arith.addf %98, %102 : vector<2x64x64xf32>
    %c0_52 = arith.constant 0 : index
    %c0_53 = arith.constant 0 : index
    %c0_54 = arith.constant 0 : index
    %104 = vector.load %arg10[%c0_52, %c0_53, %c0_54] : memref<2x64x64xf32, #tpu.memory_space<vmem>>, vector<2x64x64xf32>
    tpu.vector_store %arg10[%c0_52, %c0_53, %c0_54], %103 {strides = array<i32>} : memref<2x64x64xf32, #tpu.memory_space<vmem>>, vector<2x64x64xf32>,
    return
  }
  func.func @transform_0(%arg0: i32) -> (i32, i32, i32, i32) {
    %c0_i32 = arith.constant 0 : i32
    %c0_i32_0 = arith.constant 0 : i32
    %c0_i32_1 = arith.constant 0 : i32
    %c0_i32_2 = arith.constant 0 : i32
    %c0_i32_3 = arith.constant 0 : i32
    return %c0_i32, %c0_i32_0, %c0_i32_1, %c0_i32_2 : i32, i32, i32, i32
  }
  func.func @transform_1(%arg0: i32) -> (i32, i32) {
    %c0_i32 = arith.constant 0 : i32
    %c0_i32_0 = arith.constant 0 : i32
    %c0_i32_1 = arith.constant 0 : i32
    return %c0_i32, %c0_i32_0 : i32, i32
  }
  func.func @transform_2(%arg0: i32) -> (i32, i32) {
    %c0_i32 = arith.constant 0 : i32
    %c0_i32_0 = arith.constant 0 : i32
    %c0_i32_1 = arith.constant 0 : i32
    return %c0_i32, %c0_i32_0 : i32, i32
  }
  func.func @transform_3(%arg0: i32) -> (i32, i32) {
    %c0_i32 = arith.constant 0 : i32
    %c0_i32_0 = arith.constant 0 : i32
    %c0_i32_1 = arith.constant 0 : i32
    return %c0_i32, %c0_i32_0 : i32, i32
  }
  func.func @transform_4(%arg0: i32) -> (i32, i32) {
    %c0_i32 = arith.constant 0 : i32
    %c0_i32_0 = arith.constant 0 : i32
    %c0_i32_1 = arith.constant 0 : i32
    return %c0_i32, %c0_i32_0 : i32, i32
  }
  func.func @transform_5(%arg0: i32) -> (i32, i32) {
    %c0_i32 = arith.constant 0 : i32
    %c0_i32_0 = arith.constant 0 : i32
    %c0_i32_1 = arith.constant 0 : i32
    return %c0_i32, %c0_i32_0 : i32, i32
  }
  func.func @transform_6(%arg0: i32) -> (i32, i32) {
    %c0_i32 = arith.constant 0 : i32
    %c0_i32_0 = arith.constant 0 : i32
    %c0_i32_1 = arith.constant 0 : i32
    return %c0_i32, %c0_i32_0 : i32, i32
  }
  func.func @transform_7(%arg0: i32) -> (i32, i32, i32) {
    %c0_i32 = arith.constant 0 : i32
    %c0_i32_0 = arith.constant 0 : i32
    %c0_i32_1 = arith.constant 0 : i32
    %c0_i32_2 = arith.constant 0 : i32
    return %c0_i32, %c0_i32_0, %c0_i32_1 : i32, i32, i32
  }
  func.func @transform_8(%arg0: i32) -> (i32, i32) {
    %c0_i32 = arith.constant 0 : i32
    %c0_i32_0 = arith.constant 0 : i32
    %c0_i32_1 = arith.constant 0 : i32
    return %c0_i32, %c0_i32_0 : i32, i32
  }
  func.func @transform_9(%arg0: i32) -> (i32, i32, i32) {
    %c0_i32 = arith.constant 0 : i32
    %c0_i32_0 = arith.constant 0 : i32
    %c0_i32_1 = arith.constant 0 : i32
    %c0_i32_2 = arith.constant 0 : i32
    return %c0_i32, %c0_i32_0, %c0_i32_1 : i32, i32, i32
  }
}

</mosaic_0001>

<bundles_post_ra>
// kernel: tpu_custom_call.1
= control target key start
LH: loop header
LB: loop body
LE: loop exit
PB: predicated region body
PF: predicated region fallthrough
CT: control target
= control target key end

     0   :  { %vm333_vm0 = vcmask 523264   ;;  %vm74_vm1 = vsmask.f32 3328  ;;  %s2688_s23 = smov 64   ;;  %vm75_vm2 = vsmask.f32 7440  ;;  %s4038_s0 = inlined_call_operand.vmem [shape: bf16[2,10,10,64], index: 0, kind: input, shape index: {}]   ;;  %s4039_s1 = inlined_call_operand.vmem [shape: bf16[64,64], index: 1, kind: input, shape index: {}]   ;;  %s4040_s2 = inlined_call_operand.vmem [shape: bf16[576,64], index: 2, kind: input, shape index: {}]   ;;  %s4041_s3 = inlined_call_operand.vmem [shape: f32[2,64], index: 3, kind: input, shape index: {}]   ;;  %s4042_s4 = inlined_call_operand.vmem [shape: f32[2,64], index: 4, kind: input, shape index: {}]   ;;  %s4043_s5 = inlined_call_operand.vmem [shape: f32[64,32], index: 5, kind: input, shape index: {}]   ;;  %s4044_s6 = inlined_call_operand.vmem [shape: f32[1,32], index: 6, kind: input, shape index: {}]   ;;  %s4045_s7 = inlined_call_operand.vmem [shape: f32[2,32,64], index: 7, kind: input, shape index: {}]   ;;  %s4046_s8 = inlined_call_operand.vmem [shape: f32[2,64], index: 8, kind: input, shape index: {}]   ;;  %s4047_s9 = inlined_call_operand.hbm [shape: f32[2,64,64], index: 9, kind: output, shape index: {}]  }
   0x1   :  { %v2749_v0 = vld [vmem:[%s4038_s0 + $0x8] sm:$0xf]  ;;  %v2754_v1 = vld [vmem:[%s4038_s0 + $0x10] sm:$0xf]  ;;  %v2761_v3 = vld [vmem:[%s4038_s0 + $0x18] sm:$0xf] }
   0x2   :  { %v2236_v2 = vcombine.low %v2749_v0, %v2754_v1  ;;  %v2766_v4 = vld [vmem:[%s4038_s0 + $0x20] sm:$0xf]  ;;  %v2778_v7 = vld [vmem:[%s4038_s0 + $0x4] sm:$0x1]  ;;  %v2783_v8 = vld [vmem:[%s4038_s0 + $0xc] sm:$0x1]  ;;  %v2789_v10 = vcombine.low %v2754_v1, %v2761_v3 }
   0x3   :  { %v2771_v5 = vld [vmem:[%s4038_s0] sm:$0xf]  ;;  %v2237_v6 = vcombine.low %v2761_v3, %v2766_v4  ;;  %v78_v11 = vshrl.u32 %v2749_v0, 16  ;;  %v81_v12 = vshll.u32 %v2749_v0, 16  ;;  %v87_v13 = vshll.u32 %v2783_v8, 16  ;;  %vm2833_vm3 = vmor %vm74_vm1, %vm75_vm2  ;;  %v2621_v55 = vld [vmem:[%s4039_s1 + $0x8] sm:$0xff]  }
   0x4   :  { %v2196_v9 = vcombine.low %v2771_v5, %v2749_v0  ;;  %823 = vrot.lane.b32.xlu0 %v2236_v2, %s2688_s23  ;;  %v2618_v14 = vld [vmem:[%s4039_s1] sm:$0xff]   ;;  %v618_v15 = vshrl.u32 %v2771_v5, 16  ;;  %v621_v16 = vshll.u32 %v2771_v5, 16  ;;  %v627_v17 = vshll.u32 %v2778_v7, 16  ;;  %v2805_v18 = vld [vmem:[%s4038_s0 + $0x14] sm:$0x1] }
   0x5   :  { %825 = vrot.lane.b32.xlu1 %v2237_v6, %s2688_s23  ;;  %v92_v19 = vshrl.u32 %v2754_v1, 16  ;;  %923 = vst.msk [vmem:[#allocation2 + $0x18] sm:$0xff] %vm333_vm0, %v2789_v10  ;;  %v80_v20 = vrot.slane %v78_v11, 4  ;;  %v83_v21 = vrot.slane %v81_v12, 5  ;;  %v89_v22 = vrot.slane %v87_v13, 5  ;;  %2489 = vmatprep.subr.bf16.mxu0 %v2618_v14  ;;  %v2619_v35 = vld [vmem:[%s4040_s2 + $0x40] sm:$0xff]  }
   0x6   :  { %v2813_v23 = vld [vmem:[%s4038_s0 + $0x1c] sm:$0x1]  ;;  %v95_v24 = vshll.u32 %v2754_v1, 16  ;;  %v620_v25 = vrot.slane %v618_v15, 4  ;;  %v623_v26 = vrot.slane %v621_v16, 5  ;;  %v629_v27 = vrot.slane %v627_v17, 5  ;;  %2490 = vmatpush3.bf16.msra.mxu0 %v2618_v14  ;;  %2330 = vmatprep.subr.bf16.mxu1 %v2619_v35 }
   0x7   :  { %v94_v28 = vrot.slane %v92_v19, 4  ;;  %v2819_v29 = vld [vmem:[%s4038_s0 + $0x28] sm:$0xf]  ;;  %v84_v30 = vor.u32 %v83_v21, %v80_v20  ;;  %v101_v32 = vshll.u32 %v2805_v18, 16  ;;  %v106_v33 = vshrl.u32 %v2761_v3, 16  ;;  %v2620_v46 = vld [vmem:[%s4040_s2] sm:$0xff]   ;;  %2491 = vmatprep.subr.bf16.mxu0 %v2621_v55 }
   0x8   :  { %v97_v31 = vrot.slane %v95_v24, 5  ;;  %v2826_v34 = vld [vmem:[%s4038_s0 + $0x30] sm:$0xf]  ;;  %v624_v37 = vor.u32 %v623_v26, %v620_v25  ;;  %v109_v38 = vshll.u32 %v2761_v3, 16  ;;  %v115_v39 = vshll.u32 %v2813_v23, 16  ;;  %2331 = vmatpush3.bf16.msra.mxu1 %v2620_v46  ;;  %v2622_v17 = vld [vmem:[%s4040_s2 + $0x48] sm:$0xff]  }
   0x9   :  { %v2238_v40 = vcombine.low %v2819_v29, %v2826_v34  ;;  %v2844_v41 = vld [vmem:[%s4038_s0 + $0x24] sm:$0x1]  ;;  %v85_v42 = vrot.slane %v84_v30, 4  ;;  %v103_v44 = vrot.slane %v101_v32, 5  ;;  %v108_v45 = vrot.slane %v106_v33, 4  ;;  %2332 = vmatprep.subr.bf16.mxu1 %v2622_v17  ;;  %v2625_v46 = vld [vmem:[%s4040_s2 + $0x50] sm:$0xff]  }
   0xa   :  { %v98_v43 = vor.u32 %v97_v31, %v94_v28  ;;  %v625_v47 = vrot.slane %v624_v37, 4  ;;  %v111_v48 = vrot.slane %v109_v38, 5  ;;  %v117_v49 = vrot.slane %v115_v39, 5  ;;  %v2862_v58 = vld [vmem:[%s4038_s0 + $0x2c] sm:$0x1]  ;;  %2492 = vmatpush3.bf16.msra.mxu0 %v2621_v55  ;;  %v2624_v38 = vld [vmem:[%s4039_s1 + $0x10] sm:$0xff]  }
   0xb   :  { %v120_v50 = vshrl.u32 %v2766_v4, 16  ;;  %v90_v51 = vsel %vm2833_vm3, %v85_v42, %v89_v22  ;;  %v123_v53 = vshll.u32 %v2766_v4, 16  ;;  %v129_v54 = vshll.u32 %v2844_v41, 16  ;;  %v2868_v61 = vld [vmem:[%s4038_s0 + $0x40] sm:$0xf]  ;;  %v2623_v31 = vld [vmem:[%s4040_s2 + $0x8] sm:$0xff]   ;;  %2493 = vmatprep.subr.bf16.mxu0 %v2624_v38 }
   0xc   :  { %v99_v52 = vrot.slane %v98_v43, 4  ;;  %v630_v56 = vsel %vm2833_vm3, %v625_v47, %v629_v27  ;;  %v112_v57 = vor.u32 %v111_v48, %v108_v45  ;;  %v134_v60 = vshrl.u32 %v2819_v29, 16  ;;  %v2875_v11 = vld [vmem:[%s4038_s0 + $0x34] sm:$0x1]  ;;  %v2881_v16 = vld [vmem:[%s4038_s0 + $0x38] sm:$0xf]  ;;  %2333 = vmatpush3.bf16.msra.mxu1 %v2623_v31 }
   0xd   :  { %v122_v59 = vrot.slane %v120_v50, 4  ;;  %v2204_v62 = vcombine.low %v630_v56, %v90_v51  ;;  %v125_v2 = vrot.slane %v123_v53, 5  ;;  %v131_v6 = vrot.slane %v129_v54, 5  ;;  %v2893_v22 = vld [vmem:[%s4038_s0 + $0x3c] sm:$0x1]  ;;  %2334 = vmatprep.subr.bf16.mxu1 %v2625_v46 }
   0xe   :  { %v104_v63 = vsel %vm2833_vm3, %v99_v52, %v103_v44  ;;  %v113_v12 = vrot.slane %v112_v57, 4  ;;  %v136_v14 = vrot.slane %v134_v60, 4  ;;  %v137_v15 = vshll.u32 %v2819_v29, 16  ;;  %v2905_v30 = vld [vmem:[%s4038_s0 + $0x60] sm:$0xf]  ;;  %2494 = vmatpush3.bf16.msra.mxu0 %v2624_v38 }
   0xf   :  { %v2174_v13 = vcombine.low %v90_v51, %v104_v63  ;;  %655 = vrot.lane.b32.xlu0 %v2204_v62, %s2688_s23  ;;  %v126_v19 = vor.u32 %v125_v2, %v122_v59  ;;  %v143_v20 = vshll.u32 %v2862_v58, 16  ;;  %v2239_v21 = vcombine.low %v2881_v16, %v2868_v61  ;;  %v2917_v45 = vld [vmem:[%s4038_s0 + $0x58] sm:$0xf]  ;;  %v2936_v51 = vld [vmem:[%s4038_s0 + $0x50] sm:$0xf] }
  0x10   :  { %v148_v24 = vshrl.u32 %v2826_v34, 16  ;;  %v118_v25 = vsel %vm2833_vm3, %v113_v12, %v117_v49  ;;  %v139_v26 = vrot.slane %v137_v15, 5  ;;  %v151_v27 = vshll.u32 %v2826_v34, 16  ;;  %v2941_v52 = vld [vmem:[%s4038_s0 + $0x5c] sm:$0x1] }
  0x11   :  { %334 = vst.msk [vmem:[#allocation2] sm:$0xff] %vm333_vm0, %v2174_v13  ;;  %855 = vst.msk [vmem:[#allocation2 + $0x10] sm:$0xff] %vm333_vm0, %v2174_v13  ;;  %v157_v28 = vshll.u32 %v2875_v11, 16  ;;  %v2205_v32 = vcombine.low %v104_v63, %v118_v25  ;;  %v127_v33 = vrot.slane %v126_v19, 4  ;;  %v145_v35 = vrot.slane %v143_v20, 5  ;;  %v2626_v13 = vld [vmem:[%s4040_s2 + $0x10] sm:$0xff]  }
  0x12   :  { %v150_v37 = vrot.slane %v148_v24, 4  ;;  %v140_v39 = vor.u32 %v139_v26, %v136_v14  ;;  %v153_v42 = vrot.slane %v151_v27, 5  ;;  %v162_v44 = vshrl.u32 %v2881_v16, 16  ;;  %v2952_v2 = vld [vmem:[%s4038_s0 + $0x54] sm:$0x1]  ;;  %2335 = vmatpush3.bf16.msra.mxu1 %v2626_v13  ;;  %v2627_v27 = vld [vmem:[%s4039_s1 + $0x18] sm:$0xff]  }
  0x13   :  { %v159_v43 = vrot.slane %v157_v28, 5  ;;  %657 = vrot.lane.b32.xlu1 %v2205_v32, %s2688_s23  ;;  %827 = vrot.lane.b32.xlu0 %v2238_v40, %s2688_s23  ;;  %v132_v47 = vsel %vm2833_vm3, %v127_v33, %v131_v6  ;;  %v165_v48 = vshll.u32 %v2881_v16, 16  ;;  %v171_v49 = vshll.u32 %v2893_v22, 16  ;;  %v2989_v46 = vld [vmem:[%s4038_s0 + $0x68] sm:$0xf] }
  0x14   :  { %v2240_v50 = vcombine.low %v2917_v45, %v2905_v30  ;;  %v141_v40 = vrot.slane %v140_v39, 4  ;;  %v2175_v53 = vcombine.low %v118_v25, %v132_v47  ;;  %v154_v54 = vor.u32 %v153_v42, %v150_v37  ;;  %v2972_v37 = vld [vmem:[%s4038_s0 + $0x70] sm:$0xf]  ;;  %2495 = vmatprep.subr.bf16.mxu0 %v2627_v27 }
  0x15   :  { %v164_v55 = vrot.slane %v162_v44, 4  ;;  %v167_v56 = vrot.slane %v165_v48, 5  ;;  %v173_v57 = vrot.slane %v171_v49, 5  ;;  %v190_v59 = vshrl.u32 %v2917_v45, 16  ;;  %2496 = vmatpush3.bf16.msra.mxu0 %v2627_v27 }
  0x16   :  { %v193_v60 = vshll.u32 %v2917_v45, 16  ;;  %v146_v62 = vsel %vm2833_vm3, %v141_v40, %v145_v35  ;;  %335 = vst.msk [vmem:[#allocation2 + $0x28] sm:$0xff] %vm333_vm0, %v2175_v53  ;;  %856 = vst.msk [vmem:[#allocation2 + $0x38] sm:$0xff] %vm333_vm0, %v2175_v53  ;;  %v155_v63 = vrot.slane %v154_v54, 4  ;;  %v199_v6 = vshll.u32 %v2941_v52, 16 }
  0x17   :  { %v632_v12 = vshrl.u32 %v2936_v51, 16  ;;  %v2206_v14 = vcombine.low %v132_v47, %v146_v62  ;;  %829 = vrot.lane.b32.xlu0 %v2239_v21, %s2688_s23  ;;  %v168_v15 = vor.u32 %v167_v56, %v164_v55  ;;  %v192_v17 = vrot.slane %v190_v59, 4  ;;  %v2628_v47 = vld [vmem:[%s4040_s2 + $0x58] sm:$0xff]  }
  0x18   :  { %v195_v19 = vrot.slane %v193_v60, 5  ;;  %v160_v20 = vsel %vm2833_vm3, %v155_v63, %v159_v43  ;;  %v201_v24 = vrot.slane %v199_v6, 5  ;;  %v635_v26 = vshll.u32 %v2936_v51, 16  ;;  %2336 = vmatprep.subr.bf16.mxu1 %v2628_v47  ;;  %v3036_v63 = vld [vmem:[%s4038_s0 + $0x80] sm:$0xf] }
  0x19   :  { %v634_v25 = vrot.slane %v632_v12, 4  ;;  %659 = vrot.lane.b32.xlu1 %v2206_v14, %s2688_s23  ;;  %v169_v28 = vrot.slane %v168_v15, 4  ;;  %v2176_v31 = vcombine.low %v146_v62, %v160_v20  ;;  %v641_v32 = vshll.u32 %v2952_v2, 16  ;;  %v3031_v62 = vld [vmem:[%s4038_s0 + $0x78] sm:$0xf]  ;;  %v342_v6 = vld [vmem:[#allocation2] sm:$0xff] }
  0x1a   :  { %v196_v21 = vor.u32 %v195_v19, %v192_v17  ;;  %v637_v33 = vrot.slane %v635_v26, 5  ;;  %vm704_vm4 = vcmask 1042432   ;;  %vm705_vm5 = vcmask 1046532   ;;  %2497 = vmatprep.mubr.msk.bf16.mxu0 %vm333_vm0, %v342_v6  ;;  %609 = vst.msk [vmem:[#allocation2] sm:$0xff] %vm333_vm0, %v2196_v9  ;;  %v3068_v26 = vld [vmem:[%s4038_s0 + $0x74] sm:$0x1] }
  0x1b   :  { %v2213_v35 = vrot.slane %v2749_v0, 9  ;;  %v2976_v38 = vsel %vm2833_vm3, %v169_v28, %v173_v57  ;;  %336 = vst.msk [vmem:[#allocation2 + $0x50] sm:$0xff] %vm333_vm0, %v2176_v31  ;;  %857 = vst.msk [vmem:[#allocation2 + $0x60] sm:$0xff] %vm333_vm0, %v2176_v31  ;;  %831 = vrot.lane.b32.xlu0 %v2240_v50, %s2688_s23  ;;  %v643_v42 = vrot.slane %v641_v32, 5  ;;  %v713_v44 = vrot.slane %v2783_v8, 5  ;;  %v2631_v6 = vld [vmem:[%s4040_s2 + $0x20] sm:$0xff]  }
  0x1c   :  { %v197_v39 = vrot.slane %v196_v21, 4  ;;  %vm2981_vm6 = vmor %vm704_vm4, %vm705_vm5  ;;  %v2207_v48 = vcombine.low %v160_v20, %v2976_v38  ;;  %v638_v49 = vor.u32 %v637_v33, %v634_v25  ;;  %v2214_v50 = vrot.slane %v2754_v1, 9  ;;  %v3000_v8 = vld [vmem:[%s4038_s0 + $0x64] sm:$0x1] }
  0x1d   :  { %v717_v40 = vrot.slane %v2805_v18, 5  ;;  %v3008_v54 = vsel %vm2981_vm6, %v2213_v35, %v713_v44  ;;  %v2241_v55 = vcombine.low %v2989_v46, %v2972_v37  ;;  %v2215_v1 = vrot.slane %v2761_v3, 9  ;;  %v2629_v18 = vld [vmem:[%s4040_s2 + $0x18] sm:$0xff]   ;;  %v3026_v3 = vld [vmem:[%s4038_s0 + $0x6c] sm:$0x1]  ;;  %v2630_v21 = vld [vmem:[%s4040_s2 + $0x60] sm:$0xff]  }
  0x1e   :  { %v3004_v53 = vsel %vm2833_vm3, %v197_v39, %v201_v24  ;;  %661 = vrot.lane.b32.xlu1 %v2207_v48, %s2688_s23  ;;  %v639_v56 = vrot.slane %v638_v49, 4  ;;  %v721_v59 = vrot.slane %v2813_v23, 5  ;;  %v2216_v60 = vrot.slane %v2766_v4, 9  ;;  %2337 = vmatpush3.bf16.msra.mxu1 %v2629_v18  ;;  %v343_v15 = vld [vmem:[#allocation2 + $0x28] sm:$0xff]  ;;  %v3087_v49 = vld [vmem:[%s4038_s0 + $0x7c] sm:$0x1] }
  0x1f   :  { %v3019_v57 = vsel %vm2981_vm6, %v2214_v50, %v717_v40  ;;  %v725_v12 = vrot.slane %v2844_v41, 5  ;;  %v204_v13 = vshrl.u32 %v2905_v30, 16  ;;  %v207_v14 = vshll.u32 %v2905_v30, 16  ;;  %2498 = vmatmul.mubr.msk.bf16.vlgmr.msra.gmra.mrb[0].mxu0 %vm333_vm0, %v343_v15  ;;  %610 = vst.msk [vmem:[#allocation2 + $0x28] sm:$0xff] %vm333_vm0, %v2789_v10  ;;  %2338 = vmatprep.subr.bf16.mxu1 %v2630_v21  ;;  %v3116_v15 = vld [vmem:[%s4038_s0 + $0x48] sm:$0xf] }
  0x20   :  { %v2246_v23 = vcombine.low %v3008_v54, %v3019_v57  ;;  %v644_v17 = vsel %vm2833_vm3, %v639_v56, %v643_v42  ;;  %v3052_v19 = vsel %vm2981_vm6, %v2215_v1, %v721_v59  ;;  %v213_v41 = vshll.u32 %v3000_v8, 16  ;;  %v2633_v21 = vld [vmem:[%s4040_s2 + $0x80] sm:$0xff]  }
  0x21   :  { %v218_v20 = vshrl.u32 %v2989_v46, 16  ;;  %v2208_v0 = vcombine.low %v644_v17, %v3004_v53  ;;  %v3063_v9 = vsel %vm2981_vm6, %v2216_v60, %v725_v12  ;;  %v206_v24 = vrot.slane %v204_v13, 4 }
  0x22   :  { %883 = vrot.lane.b32.xlu0 %v2246_v23, %s2688_s23  ;;  %v209_v25 = vrot.slane %v207_v14, 5  ;;  %v2247_v27 = vcombine.low %v3052_v19, %v3063_v9  ;;  %v215_v28 = vrot.slane %v213_v41, 5  ;;  %v221_v31 = vshll.u32 %v2989_v46, 16  ;;  %2339 = vmatpush3.bf16.msra.mxu1 %v2631_v6 }
  0x23   :  { %v220_v10 = vrot.slane %v218_v20, 4  ;;  %663 = vrot.lane.b32.xlu1 %v2208_v0, %s2688_s23  ;;  %v227_v33 = vshll.u32 %v3026_v3, 16  ;;  %v2242_v35 = vcombine.low %v3031_v62, %v3036_v63  ;;  %v2217_v39 = vrot.slane %v2819_v29, 9 }
  0x24   :  { %v210_v32 = vor.u32 %v209_v25, %v206_v24  ;;  %v223_v42 = vrot.slane %v221_v31, 5  ;;  %v729_v44 = vrot.slane %v2862_v58, 5  ;;  %v2218_v47 = vrot.slane %v2826_v34, 9  ;;  %v3094_v58 = vld [vmem:[%s4038_s0 + $0x44] sm:$0x1] }
  0x25   :  { %v733_v48 = vrot.slane %v2875_v11, 5  ;;  %v229_v40 = vrot.slane %v227_v33, 5  ;;  %v232_v1 = vshrl.u32 %v2972_v37, 16  ;;  %v235_v18 = vshll.u32 %v2972_v37, 16  ;;  %v2632_v24 = vld [vmem:[%s4040_s2 + $0xc0] sm:$0xff]  }
  0x26   :  { %v211_v50 = vrot.slane %v210_v32, 4  ;;  %v224_v56 = vor.u32 %v223_v42, %v220_v10  ;;  %v3098_v11 = vsel %vm2981_vm6, %v2217_v39, %v729_v44  ;;  %v241_v60 = vshll.u32 %v3068_v26, 16  ;;  %v3134_v31 = vld [vmem:[%s4038_s0 + $0x90] sm:$0xf]  ;;  %2394 = vmatprep.subr.bf16.mxu0 %v2632_v24  ;;  %v2634_v44 = vld [vmem:[%s4040_s2 + $0x68] sm:$0xff]  }
  0x27   :  { %v3102_v59 = vsel %vm2981_vm6, %v2218_v47, %v733_v48  ;;  %833 = vrot.lane.b32.xlu1 %v2241_v55, %s2688_s23  ;;  %v234_v13 = vrot.slane %v232_v1, 4  ;;  %v237_v14 = vrot.slane %v235_v18, 5  ;;  %v246_v0 = vshrl.u32 %v3031_v62, 16  ;;  %v3123_v55 = vld [vmem:[%s4038_s0 + $0x4c] sm:$0x1]  ;;  %2395 = vmatpush3.bf16.msra.mxu0 %v2633_v21 }
  0x28   :  { %v216_v23 = vsel %vm2833_vm3, %v211_v50, %v215_v28  ;;  %v2248_v12 = vcombine.low %v3098_v11, %v3102_v59  ;;  %v225_v17 = vrot.slane %v224_v56, 4  ;;  %v243_v20 = vrot.slane %v241_v60, 5  ;;  %v3152_v1 = vld [vmem:[%s4038_s0 + $0x88] sm:$0xf]  ;;  %2340 = vmatprep.subr.bf16.mxu1 %v2634_v44 }
  0x29   :  { %v2178_v41 = vcombine.low %v3004_v53, %v216_v23  ;;  %v238_v25 = vor.u32 %v237_v14, %v234_v13  ;;  %v249_v28 = vshll.u32 %v3031_v62, 16  ;;  %v255_v10 = vshll.u32 %v3087_v49, 16  ;;  %v2635_v18 = vld [vmem:[%s4040_s2 + $0x28] sm:$0xff]  }
  0x2a   :  { %v176_v53 = vshrl.u32 %v2868_v61, 16  ;;  %v230_v32 = vsel %vm2833_vm3, %v225_v17, %v229_v40  ;;  %v248_v33 = vrot.slane %v246_v0, 4  ;;  %v179_v39 = vshll.u32 %v2868_v61, 16  ;;  %2341 = vmatpush3.bf16.msra.mxu1 %v2635_v18 }
  0x2b   :  { %338 = vst.msk [vmem:[#allocation2 + $0xa0] sm:$0xff] %vm333_vm0, %v2178_v41  ;;  %859 = vst.msk [vmem:[#allocation2 + $0xb0] sm:$0xff] %vm333_vm0, %v2178_v41  ;;  %v185_v42 = vshll.u32 %v3094_v58, 16  ;;  %885 = vrot.lane.b32.xlu1 %v2247_v27, %s2688_s23  ;;  %v2209_v47 = vcombine.low %v216_v23, %v230_v32  ;;  %v239_v48 = vrot.slane %v238_v25, 4  ;;  %v251_v50 = vrot.slane %v249_v28, 5  ;;  %v2636_v28 = vld [vmem:[%s4040_s2 + $0xc8] sm:$0xff]  }
  0x2c   :  { %v257_v40 = vrot.slane %v255_v10, 5  ;;  %v178_v56 = vrot.slane %v176_v53, 4  ;;  %v181_v60 = vrot.slane %v179_v39, 5  ;;  %v932_v13 = vshrl.u32 %v3116_v15, 16  ;;  %2396 = vmatprep.subr.bf16.mxu0 %v2636_v28 }
  0x2d   :  { %v187_v6 = vrot.slane %v185_v42, 5  ;;  %665 = vrot.lane.b32.xlu0 %v2209_v47, %s2688_s23  ;;  %v244_v27 = vsel %vm2833_vm3, %v239_v48, %v243_v20  ;;  %v252_v23 = vor.u32 %v251_v50, %v248_v33  ;;  %v935_v14 = vshll.u32 %v3116_v15, 16  ;;  %v3172_v33 = vld [vmem:[%s4038_s0 + $0x84] sm:$0x1]  ;;  %v3182_v47 = vld [vmem:[%s4038_s0 + $0x8c] sm:$0x1] }
  0x2e   :  { %v941_v17 = vshll.u32 %v3123_v55, 16  ;;  %v2179_v41 = vcombine.low %v230_v32, %v244_v27  ;;  %v182_v0 = vor.u32 %v181_v60, %v178_v56  ;;  %v934_v24 = vrot.slane %v932_v13, 4 }
  0x2f   :  { %v2243_v25 = vcombine.low %v3152_v1, %v3134_v31  ;;  %v253_v10 = vrot.slane %v252_v23, 4  ;;  %v937_v53 = vrot.slane %v935_v14, 5  ;;  %v2219_v20 = vrot.slane %v2881_v16, 9 }
  0x30   :  { %v943_v21 = vrot.slane %v941_v17, 5  ;;  %339 = vst.msk [vmem:[#allocation2 + $0xc8] sm:$0xff] %vm333_vm0, %v2179_v41  ;;  %860 = vst.msk [vmem:[#allocation2 + $0xd8] sm:$0xff] %vm333_vm0, %v2179_v41  ;;  %v183_v32 = vrot.slane %v182_v0, 4  ;;  %v737_v39 = vrot.slane %v2893_v22, 5  ;;  %v2244_v42 = vrot.slane %v2868_v61, 9 }
  0x31   :  { %v867_v44 = vrot.slane %v3094_v58, 5  ;;  %835 = vrot.lane.b32.xlu0 %v2242_v35, %s2688_s23  ;;  %v3190_v48 = vsel %vm2833_vm3, %v253_v10, %v257_v40  ;;  %v938_v22 = vor.u32 %v937_v53, %v934_v24  ;;  %v2258_v50 = vrot.slane %v3116_v15, 9  ;;  %v344_v41 = vld [vmem:[#allocation2 + $0x50] sm:$0xff] }
  0x32   :  { %v981_v58 = vrot.slane %v3123_v55, 5  ;;  %v2210_v18 = vcombine.low %v244_v27, %v3190_v48  ;;  %v188_v56 = vsel %vm2833_vm3, %v183_v32, %v187_v6  ;;  %v3199_v60 = vsel %vm2981_vm6, %v2219_v20, %v737_v39  ;;  %v2637_v6 = vld [vmem:[%s4040_s2 + $0x88] sm:$0xff]   ;;  %v2638_v53 = vld [vmem:[%s4040_s2 + $0x70] sm:$0xff]   ;;  %2501 = vmatprep.mubr.msk.bf16.mxu0 %vm333_vm0, %v344_v41 }
  0x33   :  { %v3203_v35 = vsel %vm2981_vm6, %v2244_v42, %v867_v44  ;;  %v2177_v40 = vcombine.low %v2976_v38, %v188_v56  ;;  %v939_v13 = vrot.slane %v938_v22, 4  ;;  %v260_v14 = vshrl.u32 %v3036_v63, 16  ;;  %2397 = vmatpush3.bf16.msra.mxu0 %v2637_v6  ;;  %2342 = vmatprep.subr.bf16.mxu1 %v2638_v53 }
  0x34   :  { %v2249_v23 = vcombine.low %v3199_v60, %v3203_v35  ;;  %v982_v55 = vsel %vm2981_vm6, %v2258_v50, %v981_v58  ;;  %667 = vrot.lane.b32.xlu1 %v2210_v18, %s2688_s23  ;;  %v263_v17 = vshll.u32 %v3036_v63, 16  ;;  %v269_v38 = vshll.u32 %v3172_v33, 16 }
  0x35   :  { %v2260_v27 = vcombine.low %v3203_v35, %v982_v55  ;;  %887 = vrot.lane.b32.xlu0 %v2248_v12, %s2688_s23  ;;  %337 = vst.msk [vmem:[#allocation2 + $0x78] sm:$0xff] %vm333_vm0, %v2177_v40  ;;  %v944_v0 = vsel %vm2833_vm3, %v939_v13, %v943_v21  ;;  %858 = vst.msk [vmem:[#allocation2 + $0x88] sm:$0xff] %vm333_vm0, %v2177_v40  ;;  %v274_v24 = vshrl.u32 %v3152_v1, 16  ;;  %v277_v28 = vshll.u32 %v3152_v1, 16  ;;  %v2639_v21 = vld [vmem:[%s4040_s2 + $0x30] sm:$0xff]  }
  0x36   :  { %v283_v10 = vshll.u32 %v3182_v47, 16  ;;  %v2256_v20 = vcombine.low %v188_v56, %v944_v0  ;;  %v262_v12 = vrot.slane %v260_v14, 4  ;;  %v265_v32 = vrot.slane %v263_v17, 5  ;;  %2343 = vmatpush3.bf16.msra.mxu1 %v2639_v21  ;;  %v2640_v40 = vld [vmem:[%s4040_s2 + $0xd0] sm:$0xff]  }
  0x37   :  { %996 = vst.msk [vmem:[#allocation2 + $0x98] sm:$0xff] %vm333_vm0, %v2260_v27  ;;  %v271_v39 = vrot.slane %v269_v38, 5  ;;  %v276_v42 = vrot.slane %v274_v24, 4  ;;  %v279_v44 = vrot.slane %v277_v28, 5  ;;  %v2221_v50 = vrot.slane %v2917_v45, 9  ;;  %2398 = vmatprep.subr.bf16.mxu0 %v2640_v40 }
  0x38   :  { %v285_v22 = vrot.slane %v283_v10, 5  ;;  %837 = vrot.lane.b32.xlu1 %v2243_v25, %s2688_s23  ;;  %v266_v58 = vor.u32 %v265_v32, %v262_v12  ;;  %v745_v18 = vrot.slane %v2941_v52, 5  ;;  %v2222_v56 = vrot.slane %v2905_v30, 9  ;;  %v2641_v52 = vld [vmem:[%s4040_s2 + $0x90] sm:$0xff]   ;;  %v73_v24 = vld [vmem:[%s4038_s0 + $0x9c] sm:$0x1] }
  0x39   :  { %v749_v35 = vrot.slane %v3000_v8, 5  ;;  %963 = vrot.lane.b32.xlu0 %v2256_v20, %s2688_s23  ;;  %v280_v13 = vor.u32 %v279_v44, %v276_v42  ;;  %v2223_v55 = vrot.slane %v2989_v46, 9  ;;  %v753_v6 = vrot.slane %v3026_v3, 5  ;;  %v3260_v17 = vld [vmem:[%s4038_s0 + $0x94] sm:$0x1]  ;;  %2399 = vmatpush3.bf16.msra.mxu0 %v2641_v52  ;;  %v2642_v32 = vld [vmem:[%s4040_s2 + $0x78] sm:$0xff]  }
  0x3a   :  { %v2224_v25 = vrot.slane %v2972_v37, 9  ;;  %v267_v27 = vrot.slane %v266_v58, 4  ;;  %v3254_v8 = vsel %vm2981_vm6, %v2221_v50, %v745_v18  ;;  %v757_v14 = vrot.slane %v3068_v26, 5  ;;  %v3265_v3 = vld [vmem:[%s4038_s0 + $0x98] sm:$0xf]  ;;  %2344 = vmatprep.subr.bf16.mxu1 %v2642_v32 }
  0x3b   :  { %v281_v38 = vrot.slane %v280_v13, 4  ;;  %v3269_v41 = vsel %vm2981_vm6, %v2222_v56, %v749_v35  ;;  %v3273_v0 = vsel %vm2981_vm6, %v2223_v55, %v753_v6  ;;  %v2225_v26 = vrot.slane %v3031_v62, 9  ;;  %v2644_v35 = vld [vmem:[%s4040_s2 + $0xd8] sm:$0xff]  }
  0x3c   :  { %v272_v28 = vsel %vm2833_vm3, %v267_v27, %v271_v39  ;;  %v3283_v10 = vsel %vm2981_vm6, %v2224_v25, %v757_v14  ;;  %v761_v53 = vrot.slane %v3087_v49, 5  ;;  %v2226_v20 = vrot.slane %v3036_v63, 9  ;;  %v345_v12 = vld [vmem:[#allocation2 + $0x78] sm:$0xff]  ;;  %2400 = vmatprep.subr.bf16.mxu0 %v2644_v35 }
  0x3d   :  { %889 = vrot.lane.b32.xlu0 %v2249_v23, %s2688_s23  ;;  %v286_v21 = vsel %vm2833_vm3, %v281_v38, %v285_v22  ;;  %v2180_v39 = vcombine.low %v3190_v48, %v272_v28  ;;  %v2251_v42 = vcombine.low %v3273_v0, %v3283_v10  ;;  %v765_v44 = vrot.slane %v3172_v33, 5  ;;  %2502 = vmatmul.mubr.msk.bf16.gmra.mrb[4].mxu0 %vm333_vm0, %v345_v12  ;;  %v2643_v49 = vld [vmem:[%s4040_s2 + $0x38] sm:$0xff]   ;;  %v346_v12 = vld [vmem:[#allocation2 + $0xa0] sm:$0xff] }
  0x3e   :  { %v2211_v50 = vcombine.low %v272_v28, %v286_v21  ;;  %v2250_v23 = vcombine.low %v3254_v8, %v3269_v41  ;;  %v288_v58 = vshrl.u32 %v3134_v31, 16  ;;  %v291_v22 = vshll.u32 %v3134_v31, 16  ;;  %2345 = vmatpush3.bf16.msra.mxu1 %v2643_v49  ;;  %v2645_v25 = vld [vmem:[%s4040_s2 + $0x98] sm:$0xff]   ;;  %2505 = vmatprep.mubr.msk.bf16.mxu0 %vm333_vm0, %v346_v12  ;;  %v3335_v49 = vld [vmem:[%s4040_s2 + $0x100] sm:$0xff]  }
  0x3f   :  { %340 = vst.msk [vmem:[#allocation2 + $0xf0] sm:$0xff] %vm333_vm0, %v2180_v39  ;;  %861 = vst.msk [vmem:[#allocation2 + $0x100] sm:$0xff] %vm333_vm0, %v2180_v39  ;;  %v3309_v33 = vsel %vm2981_vm6, %v2225_v26, %v761_v53  ;;  %v297_v48 = vshll.u32 %v3260_v17, 16  ;;  %v946_v18 = vshrl.u32 %v3265_v3, 16  ;;  %v949_v56 = vshll.u32 %v3265_v3, 16  ;;  %2401 = vmatpush3.bf16.msra.mxu0 %v2645_v25  ;;  %2513 = vmatprep.subr.bf16.mxu1 %v3335_v49 }
  0x40   :  { %669 = vrot.lane.b32.xlu1 %v2211_v50, %s2688_s23  ;;  %v3320_v40 = vsel %vm2981_vm6, %v2226_v20, %v765_v44  ;;  %v290_v13 = vrot.slane %v288_v58, 4  ;;  %v293_v55 = vrot.slane %v291_v22, 5  ;;  %v955_v6 = vshll.u32 %v73_v24, 16 }
  0x41   :  { %893 = vrot.lane.b32.xlu0 %v2251_v42, %s2688_s23  ;;  %v299_v52 = vrot.slane %v297_v48, 5  ;;  %v948_v27 = vrot.slane %v946_v18, 4  ;;  %v951_v14 = vrot.slane %v949_v56, 5  ;;  %v2227_v38 = vrot.slane %v3152_v1, 9 }
  0x42   :  { %v294_v26 = vor.u32 %v293_v55, %v290_v13  ;;  %v957_v28 = vrot.slane %v955_v6, 5  ;;  %v769_v53 = vrot.slane %v3182_v47, 5  ;;  %v2245_v20 = vrot.slane %v3134_v31, 9  ;;  %v2647_v55 = vld [vmem:[%s4040_s2 + $0xe0] sm:$0xff]  }
  0x43   :  { %v952_v32 = vor.u32 %v951_v14, %v948_v27  ;;  %v871_v39 = vrot.slane %v3260_v17, 5  ;;  %v2259_v44 = vrot.slane %v3265_v3, 9  ;;  %v985_v42 = vrot.slane %v73_v24, 5  ;;  %v347_v24 = vld [vmem:[#allocation2 + $0xc8] sm:$0xff]  ;;  %v2648_v27 = vld [vmem:[%s4040_s2 + $0xa0] sm:$0xff]   ;;  %2402 = vmatprep.subr.bf16.mxu0 %v2647_v55 }
  0x44   :  { %891 = vrot.lane.b32.xlu1 %v2250_v23, %s2688_s23  ;;  %v2252_v47 = vcombine.low %v3309_v33, %v3320_v40  ;;  %v295_v50 = vrot.slane %v294_v26, 4  ;;  %v3342_v58 = vsel %vm2981_vm6, %v2227_v38, %v769_v53  ;;  %v2212_v17 = vrot.slane %v2771_v5, 9  ;;  %2403 = vmatpush3.bf16.msra.mxu0 %v2648_v27 }
  0x45   :  { %v953_v22 = vrot.slane %v952_v32, 4  ;;  %v872_v48 = vsel %vm2981_vm6, %v2245_v20, %v871_v39  ;;  %v986_v18 = vsel %vm2981_vm6, %v2259_v44, %v985_v42  ;;  %v709_v23 = vrot.slane %v2778_v7, 5  ;;  %2506 = vmatmul.mubr.msk.bf16.gmra.mrb[8].mxu0 %vm333_vm0, %v347_v24 }
  0x46   :  { %v300_v56 = vsel %vm2833_vm3, %v295_v50, %v299_v52  ;;  %v2253_v35 = vcombine.low %v3342_v58, %v872_v48  ;;  %v2261_v5 = vcombine.low %v872_v48, %v986_v18  ;;  %v2229_v13 = vcombine.low %v3019_v57, %v3052_v19 }
  0x47   :  { %v2181_v6 = vcombine.low %v286_v21, %v300_v56  ;;  %v958_v7 = vsel %vm2833_vm3, %v953_v22, %v957_v28  ;;  %v710_v25 = vsel %vm2981_vm6, %v2212_v17, %v709_v23  ;;  %v2230_v52 = vcombine.low %v3063_v9, %v3098_v11  ;;  %v2649_v11 = vld [vmem:[%s4040_s2 + $0xe8] sm:$0xff]  }
  0x48   :  { %895 = vrot.lane.b32.xlu1 %v2252_v47, %s2688_s23  ;;  %v2257_v57 = vcombine.low %v300_v56, %v958_v7  ;;  %1000 = vst.msk [vmem:[#allocation2 + $0x138] sm:$0xff] %vm333_vm0, %v2261_v5  ;;  %v2228_v19 = vcombine.low %v710_v25, %v3008_v54  ;;  %804 = vst.msk [vmem:[#allocation2 + $0x30] sm:$0xff] %vm333_vm0, %v2229_v13  ;;  %v2198_v36 = vcombine.low %v2766_v4, %v2819_v29 }
  0x49   :  { %993 = vst.msk [vmem:[#allocation2 + $0x20] sm:$0xff] %vm333_vm0, %v2229_v13  ;;  %v2231_v9 = vcombine.low %v3102_v59, %v3199_v60  ;;  %341 = vst.msk [vmem:[#allocation2 + $0x118] sm:$0xff] %vm333_vm0, %v2181_v6  ;;  %v2199_v54 = vcombine.low %v2826_v34, %v2881_v16  ;;  %v2220_v4 = vrot.slane %v2936_v51, 9  ;;  %v741_v29 = vrot.slane %v2952_v2, 5  ;;  %v348_v59 = vld [vmem:[#allocation2 + $0xf0] sm:$0xff]  ;;  %v2650_v34 = vld [vmem:[%s4040_s2 + $0xa8] sm:$0xff]   ;;  %2404 = vmatprep.subr.bf16.mxu0 %v2649_v11 }
  0x4a   :  { %862 = vst.msk [vmem:[#allocation2 + $0x128] sm:$0xff] %vm333_vm0, %v2181_v6  ;;  %805 = vst.msk [vmem:[#allocation2 + $0x58] sm:$0xff] %vm333_vm0, %v2230_v52  ;;  %v2200_v60 = vcombine.low %v2936_v51, %v2917_v45  ;;  %965 = vrot.lane.b32.xlu0 %v2257_v57, %s2688_s23  ;;  %v2233_v16 = vcombine.low %v3269_v41, %v3273_v0  ;;  %v2201_v45 = vcombine.low %v2905_v30, %v2989_v46  ;;  %v2651_v41 = vld [vmem:[%s4040_s2 + $0xf0] sm:$0xff]  }
  0x4b   :  { %994 = vst.msk [vmem:[#allocation2 + $0x48] sm:$0xff] %vm333_vm0, %v2230_v52  ;;  %803 = vst.msk [vmem:[#allocation2 + $0x8] sm:$0xff] %vm333_vm0, %v2228_v19  ;;  %v2234_v51 = vcombine.low %v3283_v10, %v3309_v33  ;;  %v742_v2 = vsel %vm2981_vm6, %v2220_v4, %v741_v29  ;;  %2509 = vmatprep.mubr.msk.bf16.mxu0 %vm333_vm0, %v348_v59  ;;  %v2202_v30 = vcombine.low %v2972_v37, %v3031_v62 }
  0x4c   :  { %611 = vst.msk [vmem:[#allocation2 + $0x50] sm:$0xff] %vm333_vm0, %v2198_v36  ;;  %924 = vst.msk [vmem:[#allocation2 + $0x40] sm:$0xff] %vm333_vm0, %v2198_v36  ;;  %v2254_v46 = vcombine.low %v2868_v61, %v3116_v15  ;;  %897 = vrot.lane.b32.xlu1 %v2253_v35, %s2688_s23  ;;  %v2232_v43 = vcombine.low %v742_v2, %v3254_v8  ;;  %v2235_v37 = vcombine.low %v3320_v40, %v3342_v58  ;;  %v2652_v15 = vld [vmem:[%s4040_s2 + $0xb0] sm:$0xff]  }
  0x4d   :  { %806 = vst.msk [vmem:[#allocation2 + $0x80] sm:$0xff] %vm333_vm0, %v2231_v9  ;;  %995 = vst.msk [vmem:[#allocation2 + $0x70] sm:$0xff] %vm333_vm0, %v2231_v9  ;;  %v2203_v61 = vcombine.low %v3036_v63, %v3152_v1  ;;  %v2255_v62 = vcombine.low %v3134_v31, %v3265_v3  ;;  %2405 = vmatpush3.bf16.msra.mxu0 %v2650_v34  ;;  %v2653_v63 = vld [vmem:[%s4040_s2 + $0xf8] sm:$0xff]  }
  0x4e   :  { %612 = vst.msk [vmem:[#allocation2 + $0x78] sm:$0xff] %vm333_vm0, %v2199_v54  ;;  %925 = vst.msk [vmem:[#allocation2 + $0x68] sm:$0xff] %vm333_vm0, %v2199_v54  ;;  %2406 = vmatprep.subr.bf16.mxu0 %v2651_v41  ;;  %v2654_v1 = vld [vmem:[%s4040_s2 + $0xb8] sm:$0xff]  }
  0x4f   :  { %613 = vst.msk [vmem:[#allocation2 + $0xa0] sm:$0xff] %vm333_vm0, %v2200_v60  ;;  %808 = vst.msk [vmem:[#allocation2 + $0xd0] sm:$0xff] %vm333_vm0, %v2233_v16 }
  0x50   :  { %997 = vst.msk [vmem:[#allocation2 + $0xc0] sm:$0xff] %vm333_vm0, %v2233_v16  ;;  %614 = vst.msk [vmem:[#allocation2 + $0xc8] sm:$0xff] %vm333_vm0, %v2201_v45  ;;  %v349_v31 = vld [vmem:[#allocation2 + $0x118] sm:$0xff] }
  0x51   :  { %927 = vst.msk [vmem:[#allocation2 + $0xb8] sm:$0xff] %vm333_vm0, %v2201_v45  ;;  %809 = vst.msk [vmem:[#allocation2 + $0xf8] sm:$0xff] %vm333_vm0, %v2234_v51  ;;  %2510 = vmatmul.mubr.msk.bf16.gmra.mrb[12].mxu0 %vm333_vm0, %v349_v31 }
  0x52   :  { %998 = vst.msk [vmem:[#allocation2 + $0xe8] sm:$0xff] %vm333_vm0, %v2234_v51  ;;  %615 = vst.msk [vmem:[#allocation2 + $0xf0] sm:$0xff] %vm333_vm0, %v2202_v30  ;;  %2407 = vmatpush3.bf16.msra.mxu0 %v2652_v15 }
  0x53   :  { %928 = vst.msk [vmem:[#allocation2 + $0xe0] sm:$0xff] %vm333_vm0, %v2202_v30  ;;  %926 = vst.msk [vmem:[#allocation2 + $0x90] sm:$0xff] %vm333_vm0, %v2254_v46 }
  0x54   :  { %807 = vst.msk [vmem:[#allocation2 + $0xa8] sm:$0xff] %vm333_vm0, %v2232_v43  ;;  %810 = vst.msk [vmem:[#allocation2 + $0x120] sm:$0xff] %vm333_vm0, %v2235_v37 }
  0x55   :  { %999 = vst.msk [vmem:[#allocation2 + $0x110] sm:$0xff] %vm333_vm0, %v2235_v37  ;;  %929 = vst.msk [vmem:[#allocation2 + $0x108] sm:$0xff] %vm333_vm0, %v2203_v61 }
  0x56   :  { %930 = vst.msk [vmem:[#allocation2 + $0x130] sm:$0xff] %vm333_vm0, %v2255_v62  ;;  %616 = vst.msk [vmem:[#allocation2 + $0x118] sm:$0xff] %vm333_vm0, %v2203_v61 }
  0x57   :  { %14 = vsyncpa [#allocation4], 0  ;;  %2408 = vmatprep.subr.bf16.mxu0 %v2653_v63  ;;  %vm679_vm7 = vcmask 1048064   ;;  %v2655_v14 = vld [vmem:[%s4040_s2 + $0x108] sm:$0xff]   ;;  %v2656_v53 = vld [vmem:[%s4040_s2 + $0x110] sm:$0xff]   ;;  %vm2690_vm8 = vmmov 0  }
  0x58   :  { %2409 = vmatpush3.bf16.msra.mxu0 %v2654_v1  ;;  %v2657_v42 = vld [vmem:[%s4040_s2 + $0x118] sm:$0xff]   ;;  %v1005_v43 = vld [vmem:[#allocation2 + $0x20] sm:$0xff]  ;;  %v1010_v62 = vld [vmem:[#allocation2 + $0x48] sm:$0xff]  ;;  %vm1780_vm9 = vcmask 1041409   ;;  %vm1863_vm10 = vcmask 261120  }
  0x59   :  { %v1015_v15 = vld [vmem:[#allocation2 + $0x70] sm:$0xff]  ;;  %v1020_v1 = vld [vmem:[#allocation2 + $0x98] sm:$0xff] }
  0x76   :  { %v824_v8 = vpop.permute.xlu0 %823 }
  0x77   :  { %847 = vst.msk [vmem:[#allocation2 + $0x8] sm:$0xff] %vm679_vm7, %v824_v8  ;;  %v826_v3 = vpop.permute.xlu1 %825  ;;  %v1025_v8 = vld [vmem:[#allocation2 + $0xc0] sm:$0xff] }
  0x78   :  { %848 = vst.msk [vmem:[#allocation2 + $0x30] sm:$0xff] %vm679_vm7, %v826_v3 }
  0x7e   :  { %v1002_v0 = vld [vmem:[#allocation2 + $0x8] sm:$0xff] }
  0x7f   :  { %1385 = vmatprep.mubr.bf16.mxu1 %v1002_v0  ;;  %v1007_v40 = vld [vmem:[#allocation2 + $0x30] sm:$0xff]  ;;  %v1030_v0 = vld [vmem:[#allocation2 + $0xe8] sm:$0xff] }
  0x81   :  { %v656_v10 = vpop.permute.xlu0 %655 }
  0x82   :  { %680 = vst.msk [vmem:[#allocation2] sm:$0xff] %vm679_vm7, %v656_v10  ;;  %v1035_v10 = vld [vmem:[#allocation2 + $0x110] sm:$0xff] }
  0x85   :  { %v658_v21 = vpop.permute.xlu1 %657  ;;  %v828_v33 = vpop.permute.xlu0 %827 }
  0x86   :  { %681 = vst.msk [vmem:[#allocation2 + $0x28] sm:$0xff] %vm679_vm7, %v658_v21  ;;  %969 = vst.msk [vmem:[#allocation2 + $0x18] sm:$0xff] %vm679_vm7, %v658_v21  ;;  %v1040_v21 = vld [vmem:[#allocation2 + $0x138] sm:$0xff] }
  0x87   :  { %849 = vst.msk [vmem:[#allocation2 + $0x58] sm:$0xff] %vm679_vm7, %v828_v33 }
  0x89   :  { %v830_v38 = vpop.permute.xlu0 %829  ;;  %v1001_v26 = vld [vmem:[#allocation2] sm:$0xff] }
  0x8a   :  { %850 = vst.msk [vmem:[#allocation2 + $0x80] sm:$0xff] %vm679_vm7, %v830_v38  ;;  %1386 = vmatmul.mubr.bf16.vlgmr.msra.gmra.mrb[0].mxu1 %v1001_v26 }
  0x8b   :  { %v660_v28 = vpop.permute.xlu1 %659  ;;  %2514 = vmatpush3.bf16.msra.mxu1 %v3335_v49  ;;  %1393 = vmatprep.mubr.bf16.mxu1 %v1007_v40 }
  0x8c   :  { %682 = vst.msk [vmem:[#allocation2 + $0x50] sm:$0xff] %vm679_vm7, %v660_v28  ;;  %970 = vst.msk [vmem:[#allocation2 + $0x40] sm:$0xff] %vm679_vm7, %v660_v28  ;;  %2515 = vmatprep.subr.bf16.mxu1 %v2655_v14 }
  0x8d   :  { %v832_v20 = vpop.permute.xlu0 %831  ;;  %v1004_v12 = vld [vmem:[#allocation2 + $0x18] sm:$0xff]  ;;  %v1006_v32 = vld [vmem:[#allocation2 + $0x28] sm:$0xff] }
  0x8e   :  { %851 = vst.msk [vmem:[#allocation2 + $0xa8] sm:$0xff] %vm679_vm7, %v832_v20  ;;  %1482 = vmatprep.mubr.bf16.mxu0 %v1004_v12  ;;  %v1012_v44 = vld [vmem:[#allocation2 + $0x58] sm:$0xff] }
  0x8f   :  { %2516 = vmatpush3.bf16.msra.mxu1 %v2655_v14 }
  0x90   :  { %v662_v39 = vpop.permute.xlu1 %661  ;;  %2517 = vmatprep.subr.bf16.mxu1 %v2656_v53 }
  0x91   :  { %683 = vst.msk [vmem:[#allocation2 + $0x78] sm:$0xff] %vm679_vm7, %v662_v39  ;;  %971 = vst.msk [vmem:[#allocation2 + $0x68] sm:$0xff] %vm679_vm7, %v662_v39  ;;  %v1017_v58 = vld [vmem:[#allocation2 + $0x80] sm:$0xff] }
  0x92   :  { %1394 = vmatmul.mubr.bf16.gmra.mrb[4].mxu1 %v1006_v32 }
  0x93   :  { %1401 = vmatprep.mubr.bf16.mxu1 %v1012_v44  ;;  %2518 = vmatpush3.bf16.msra.mxu1 %v2656_v53  ;;  %v1011_v50 = vld [vmem:[#allocation2 + $0x50] sm:$0xff]  ;;  %v1009_v24 = vld [vmem:[#allocation2 + $0x40] sm:$0xff] }
  0x94   :  { %v884_v49 = vpop.permute.xlu0 %883  ;;  %2519 = vmatprep.subr.bf16.mxu1 %v2657_v42 }
  0x95   :  { %907 = vst.msk [vmem:[#allocation2 + $0x10] sm:$0xff] %vm679_vm7, %v884_v49  ;;  %v664_v47 = vpop.permute.xlu1 %663  ;;  %v1022_v56 = vld [vmem:[#allocation2 + $0xa8] sm:$0xff] }
  0x96   :  { %684 = vst.msk [vmem:[#allocation2 + $0xa0] sm:$0xff] %vm679_vm7, %v664_v47  ;;  %v1764_v49 = vld [vmem:[%s4043_s5 + $0x8] sm:$0xff]  ;;  %v4048_v47 = vmov 0.0|0.0  }
  0x97   :  { %2520 = vmatpush3.bf16.msra.mxu1 %v2657_v42  ;;  %v1763_v42 = vld [vmem:[%s4043_s5] sm:$0xff]  ;;  %2578 = vmatprep.subr.bf16.mxu0 %v4048_v47 }
  0x98   :  { %v1016_v23 = vld [vmem:[#allocation2 + $0x78] sm:$0xff]  ;;  %v1014_v5 = vld [vmem:[#allocation2 + $0x68] sm:$0xff] }
  0x99   :  { %v834_v17 = vpop.permute.xlu1 %833 }
  0x9a   :  { %852 = vst.msk [vmem:[#allocation2 + $0xd0] sm:$0xff] %vm679_vm7, %v834_v17  ;;  %1402 = vmatmul.mubr.bf16.gmra.mrb[8].mxu1 %v1011_v50  ;;  %v2579_v50 = vpack.c.bf16 %v1764_v49, %v1763_v42 }
  0x9b   :  { %1409 = vmatprep.mubr.bf16.mxu1 %v1017_v58 }
  0x9c   :  { %v1003_v22 = vld [vmem:[#allocation2 + $0x10] sm:$0xff] }
  0x9d   :  { %1483 = vmatmul.mubr.bf16.vlgmr.msra.gmra.mrb[16].mxu0 %v1003_v22  ;;  %v886_v48 = vpop.permute.xlu1 %885  ;;  %v1021_v7 = vld [vmem:[#allocation2 + $0xa0] sm:$0xff] }
  0x9e   :  { %1490 = vmatprep.mubr.bf16.mxu0 %v1009_v24  ;;  %908 = vst.msk [vmem:[#allocation2 + $0x38] sm:$0xff] %vm679_vm7, %v886_v48  ;;  %2580 = vmatpush3.bf16.msra.mxu0 %v2579_v50  ;;  %v1765_v48 = vld [vmem:[%s4043_s5 + $0x10] sm:$0xff] }
  0x9f   :  { %v666_v18 = vpop.permute.xlu0 %665  ;;  %2581 = vmatprep.subr.bf16.mxu0 %v4048_v47 }
  0xa0   :  { %685 = vst.msk [vmem:[#allocation2 + $0xc8] sm:$0xff] %vm679_vm7, %v666_v18  ;;  %973 = vst.msk [vmem:[#allocation2 + $0xb8] sm:$0xff] %vm679_vm7, %v666_v18  ;;  %v1766_v18 = vld [vmem:[%s4043_s5 + $0x18] sm:$0xff] }
  0xa1   :  { %v1027_v25 = vld [vmem:[#allocation2 + $0xd0] sm:$0xff] }
  0xa2   :  { %1410 = vmatmul.mubr.bf16.gmra.mrb[12].mxu1 %v1016_v23  ;;  %v2582_v23 = vpack.c.bf16 %v1766_v18, %v1765_v48 }
  0xa3   :  { %v836_v35 = vpop.permute.xlu0 %835  ;;  %1417 = vmatprep.mubr.bf16.mxu1 %v1022_v56  ;;  %v1767_v56 = vld [vmem:[%s4043_s5 + $0x20] sm:$0xff] }
  0xa4   :  { %853 = vst.msk [vmem:[#allocation2 + $0xf8] sm:$0xff] %vm679_vm7, %v836_v35  ;;  %2583 = vmatpush3.bf16.msra.mxu0 %v2582_v23  ;;  %v1768_v35 = vld [vmem:[%s4043_s5 + $0x28] sm:$0xff] }
  0xa5   :  { %v1008_v13 = vld [vmem:[#allocation2 + $0x38] sm:$0xff]  ;;  %2584 = vmatprep.subr.bf16.mxu0 %v4048_v47 }
  0xa6   :  { %1491 = vmatmul.mubr.bf16.gmra.mrb[20].mxu0 %v1008_v13  ;;  %v668_v55 = vpop.permute.xlu1 %667  ;;  %v2585_v13 = vpack.c.bf16 %v1768_v35, %v1767_v56 }
  0xa7   :  { %v888_v6 = vpop.permute.xlu0 %887  ;;  %1498 = vmatprep.mubr.bf16.mxu0 %v1014_v5  ;;  %686 = vst.msk [vmem:[#allocation2 + $0xf0] sm:$0xff] %vm679_vm7, %v668_v55  ;;  %974 = vst.msk [vmem:[#allocation2 + $0xe0] sm:$0xff] %vm679_vm7, %v668_v55  ;;  %v1026_v36 = vld [vmem:[#allocation2 + $0xc8] sm:$0xff]  ;;  %v1024_v59 = vld [vmem:[#allocation2 + $0xb8] sm:$0xff] }
  0xa8   :  { %909 = vst.msk [vmem:[#allocation2 + $0x60] sm:$0xff] %vm679_vm7, %v888_v6  ;;  %v1769_v5 = vld [vmem:[%s4043_s5 + $0x30] sm:$0xff]  ;;  %v1770_v55 = vld [vmem:[%s4043_s5 + $0x38] sm:$0xff]  ;;  %v2691_v6 = vmov 0.0   ;;  %2586 = vmatpush3.bf16.msra.mxu0 %v2585_v13 }
  0xa9   :  { %2587 = vmatprep.subr.bf16.mxu0 %v4048_v47 }
  0xaa   :  { %v838_v52 = vpop.permute.xlu1 %837  ;;  %1418 = vmatmul.mubr.bf16.gmra.mrb[16].mxu1 %v1021_v7  ;;  %v2588_v7 = vpack.c.bf16 %v1770_v55, %v1769_v5 }
  0xab   :  { %v964_v27 = vpop.permute.xlu0 %963  ;;  %854 = vst.msk [vmem:[#allocation2 + $0x120] sm:$0xff] %vm679_vm7, %v838_v52  ;;  %1425 = vmatprep.mubr.bf16.mxu1 %v1027_v25  ;;  %v1032_v9 = vld [vmem:[#allocation2 + $0xf8] sm:$0xff] }
  0xac   :  { %972 = vst.msk [vmem:[#allocation2 + $0x90] sm:$0xff] %vm679_vm7, %v964_v27  ;;  %2589 = vmatpush3.bf16.msra.mxu0 %v2588_v7 }
  0xad   :  { %2590 = vmatprep.subr.bf16.mxu0 %v4048_v47 }
  0xae   :  { %v1031_v34 = vld [vmem:[#allocation2 + $0xf0] sm:$0xff]  ;;  %v1029_v41 = vld [vmem:[#allocation2 + $0xe0] sm:$0xff] }
  0xaf   :  { %v890_v57 = vpop.permute.xlu0 %889  ;;  %v1013_v19 = vld [vmem:[#allocation2 + $0x60] sm:$0xff] }
  0xb0   :  { %910 = vst.msk [vmem:[#allocation2 + $0x88] sm:$0xff] %vm679_vm7, %v890_v57  ;;  %1499 = vmatmul.mubr.bf16.gmra.mrb[24].mxu0 %v1013_v19 }
  0xb2   :  { %v670_v11 = vpop.permute.xlu1 %669  ;;  %1426 = vmatmul.mubr.bf16.gmra.mrb[20].mxu1 %v1026_v36  ;;  %v1037_v16 = vld [vmem:[#allocation2 + $0x120] sm:$0xff] }
  0xb3   :  { %687 = vst.msk [vmem:[#allocation2 + $0x118] sm:$0xff] %vm679_vm7, %v670_v11  ;;  %975 = vst.msk [vmem:[#allocation2 + $0x108] sm:$0xff] %vm679_vm7, %v670_v11  ;;  %v1019_v54 = vld [vmem:[#allocation2 + $0x90] sm:$0xff]  ;;  %1433 = vmatprep.mubr.bf16.mxu1 %v1032_v9  ;;  %v894_v4 = vpop.permute.xlu0 %893 }
  0xb4   :  { %1506 = vmatprep.mubr.bf16.mxu0 %v1019_v54  ;;  %912 = vst.msk [vmem:[#allocation2 + $0xd8] sm:$0xff] %vm679_vm7, %v894_v4 }
  0xb6   :  { %v892_v29 = vpop.permute.xlu1 %891 }
  0xb7   :  { %911 = vst.msk [vmem:[#allocation2 + $0xb0] sm:$0xff] %vm679_vm7, %v892_v29  ;;  %v1018_v60 = vld [vmem:[#allocation2 + $0x88] sm:$0xff] }
  0xb8   :  { %1507 = vmatmul.mubr.bf16.gmra.mrb[28].mxu0 %v1018_v60 }
  0xb9   :  { %1514 = vmatprep.mubr.bf16.mxu0 %v1024_v59 }
  0xba   :  { %1434 = vmatmul.mubr.bf16.gmra.mrb[24].mxu1 %v1031_v34  ;;  %v896_v45 = vpop.permute.xlu1 %895  ;;  %v1036_v46 = vld [vmem:[#allocation2 + $0x118] sm:$0xff]  ;;  %v1034_v61 = vld [vmem:[#allocation2 + $0x108] sm:$0xff] }
  0xbb   :  { %1441 = vmatprep.mubr.bf16.mxu1 %v1037_v16  ;;  %913 = vst.msk [vmem:[#allocation2 + $0x100] sm:$0xff] %vm679_vm7, %v896_v45  ;;  %v1028_v37 = vld [vmem:[#allocation2 + $0xd8] sm:$0xff] }
  0xbc   :  { %v966_v51 = vpop.permute.xlu0 %965 }
  0xbd   :  { %976 = vst.msk [vmem:[#allocation2 + $0x130] sm:$0xff] %vm679_vm7, %v966_v51 }
  0xbe   :  { %v1023_v2 = vld [vmem:[#allocation2 + $0xb0] sm:$0xff]  ;;  %v898_v30 = vpop.permute.xlu1 %897 }
  0xbf   :  { %914 = vst.msk [vmem:[#allocation2 + $0x128] sm:$0xff] %vm679_vm7, %v898_v30 }
  0xc0   :  { %1515 = vmatmul.mubr.bf16.gmra.mrb[32].mxu0 %v1023_v2 }
  0xc1   :  { %1522 = vmatprep.mubr.bf16.mxu0 %v1029_v41 }
  0xc2   :  { %1442 = vmatmul.mubr.bf16.gmra.mrb[28].mxu1 %v1036_v46  ;;  %v1033_v63 = vld [vmem:[#allocation2 + $0x100] sm:$0xff] }
  0xc3   :  { %2521 = vmatprep.mubr.msk.bf16.mxu1 %vm333_vm0, %v1005_v43 }
  0xc4   :  { %v1039_v31 = vld [vmem:[#allocation2 + $0x130] sm:$0xff] }
  0xc6   :  { %v1038_v3 = vld [vmem:[#allocation2 + $0x128] sm:$0xff] }
  0xc8   :  { %1523 = vmatmul.mubr.bf16.gmra.mrb[36].mxu0 %v1028_v37 }
  0xc9   :  { %1530 = vmatprep.mubr.bf16.mxu0 %v1034_v61 }
  0xca   :  { %2522 = vmatmul.mubr.msk.bf16.vlgmr.msra.gmra.mrb[32].mxu1 %vm333_vm0, %v1010_v62 }
  0xcb   :  { %2525 = vmatprep.mubr.msk.bf16.mxu1 %vm333_vm0, %v1015_v15 }
  0xd0   :  { %1531 = vmatmul.mubr.bf16.gmra.mrb[40].mxu0 %v1033_v63 }
  0xd1   :  { %1538 = vmatprep.mubr.bf16.mxu0 %v1039_v31 }
  0xd2   :  { %2526 = vmatmul.mubr.msk.bf16.gmra.mrb[36].mxu1 %vm333_vm0, %v1020_v1 }
  0xd3   :  { %2529 = vmatprep.mubr.msk.bf16.mxu1 %vm333_vm0, %v1025_v8 }
  0xd8   :  { %1539 = vmatmul.mubr.bf16.gmra.mrb[44].mxu0 %v1038_v3 }
  0xd9   :  { %2553 = vmatprep.mubr.msk.f32.mxu0 %vm2690_vm8, %v2691_v6 }
  0xda   :  { %2530 = vmatmul.mubr.msk.bf16.gmra.mrb[40].mxu1 %vm333_vm0, %v1030_v0 }
  0xdb   :  { %2533 = vmatprep.mubr.msk.bf16.mxu1 %vm333_vm0, %v1035_v10 }
  0xe2   :  { %2534 = vmatmul.mubr.msk.bf16.gmra.mrb[44].mxu1 %vm333_vm0, %v1040_v21 }
  0xf2   :  { %v3502_v33 = vpop.f32.mrb[0].mxu0 }
  0xf3   :  { %v3504_v40 = vpop.f32.mrb[1].mxu0 }
  0xf4   :  { %v3506_v14 = vpop.f32.mrb[2].mxu0 }
  0xf5   :  { %v3508_v38 = vpop.f32.mrb[3].mxu0 }
 0x110   :  { %v3510_v26 = vpop.f32.mrb[4].mxu0 }
 0x111   :  { %v3512_v28 = vpop.f32.mrb[5].mxu0 }
 0x112   :  { %v3514_v53 = vpop.f32.mrb[6].mxu0 }
 0x113   :  { %v3516_v20 = vpop.f32.mrb[7].mxu0 }
 0x118   :  { %v3518_v12 = vpop.f32.mrb[8].mxu0 }
 0x119   :  { %v3520_v32 = vpop.f32.mrb[9].mxu0 }
 0x11a   :  { %v3522_v39 = vpop.f32.mrb[10].mxu0 }
 0x11b   :  { %v3524_v44 = vpop.f32.mrb[11].mxu0 }
 0x124   :  { %v3534_v58 = vpop.f32.mrb[12].mxu0 }
 0x125   :  { %v3536_v17 = vpop.f32.mrb[13].mxu0 }
 0x126   :  { %v3538_v24 = vpop.f32.mrb[14].mxu0 }
 0x127   :  { %v3540_v22 = vpop.f32.mrb[15].mxu0 }
 0x15d   :  { %v2346_v25 = vpop.f32.mrb[0].mxu1 }
 0x15e   :  { %v2347_v52 = vpop.f32.mrb[1].mxu1 }
 0x15f   :  { %v2348_v27 = vadd.f32 %v2347_v52, %v2346_v25  ;;  %v2349_v57 = vpop.f32.mrb[2].mxu1 }
 0x160   :  { %v2350_v19 = vpop.f32.mrb[3].mxu1 }
 0x161   :  { %v2351_v36 = vadd.f32 %v2350_v19, %v2349_v57 }
 0x165   :  { %v2352_v9 = vpop.f32.mrb[4].mxu1 }
 0x166   :  { %v2353_v11 = vpop.f32.mrb[5].mxu1 }
 0x167   :  { %v2354_v54 = vadd.f32 %v2353_v11, %v2352_v9  ;;  %v2355_v4 = vpop.f32.mrb[6].mxu1 }
 0x168   :  { %v2356_v29 = vpop.f32.mrb[7].mxu1 }
 0x169   :  { %v2357_v59 = vadd.f32 %v2356_v29, %v2355_v4 }
 0x16d   :  { %v2358_v60 = vpop.f32.mrb[8].mxu1 }
 0x16e   :  { %v2359_v34 = vpop.f32.mrb[9].mxu1 }
 0x16f   :  { %v2360_v45 = vadd.f32 %v2359_v34, %v2358_v60  ;;  %v2361_v51 = vpop.f32.mrb[10].mxu1 }
 0x170   :  { %v2410_v16 = vpop.f32.mrb[16].mxu0  ;;  %v2362_v41 = vpop.f32.mrb[11].mxu1 }
 0x171   :  { %v2411_v2 = vpop.f32.mrb[17].mxu0  ;;  %v2363_v43 = vadd.f32 %v2362_v41, %v2361_v51 }
 0x172   :  { %v2412_v30 = vadd.f32 %v2411_v2, %v2410_v16  ;;  %v2413_v46 = vpop.f32.mrb[18].mxu0 }
 0x173   :  { %v2414_v37 = vpop.f32.mrb[19].mxu0 }
 0x174   :  { %v2415_v61 = vadd.f32 %v2414_v37, %v2413_v46  ;;  %v3565_v62 = vadd.f32 %v2412_v30, %v2348_v27 }
 0x175   :  { %v2364_v15 = vpop.f32.mrb[12].mxu1 }
 0x176   :  { %v3567_v63 = vadd.f32 %v2415_v61, %v2351_v36  ;;  %v2365_v31 = vpop.f32.mrb[13].mxu1 }
 0x177   :  { %v2366_v1 = vadd.f32 %v2365_v31, %v2364_v15  ;;  %v2367_v8 = vpop.f32.mrb[14].mxu1 }
 0x178   :  { %v2368_v3 = vpop.f32.mrb[15].mxu1 }
 0x179   :  { %v2416_v0 = vpop.f32.mrb[20].mxu0  ;;  %v2369_v10 = vadd.f32 %v2368_v3, %v2367_v8  ;;  %v3588_v3 = vld [vmem:[%s4041_s3] ss:$0 sm:$0xff] }
 0x17a   :  { %v2417_v21 = vpop.f32.mrb[21].mxu0 }
 0x17b   :  { %v2418_v42 = vadd.f32 %v2417_v21, %v2416_v0  ;;  %v2419_v49 = vpop.f32.mrb[22].mxu0 }
 0x17c   :  { %v2420_v50 = vpop.f32.mrb[23].mxu0 }
 0x17d   :  { %v2421_v48 = vadd.f32 %v2420_v50, %v2419_v49  ;;  %v2370_v18 = vpop.f32.mrb[16].mxu1  ;;  %v3569_v23 = vadd.f32 %v2418_v42, %v2354_v54  ;;  %v511_v42 = vmul.f32 %v3502_v33, %v3588_v3  ;;  %v509_v50 = vmul.f32 %v3588_v3, %v3504_v40 }
 0x17e   :  { %v2371_v56 = vpop.f32.mrb[17].mxu1  ;;  %v515_v40 = vmul.f32 %v3510_v26, %v3588_v3  ;;  %v516_v26 = vmul.f32 %v3514_v53, %v3588_v3 }
 0x17f   :  { %v2372_v35 = vadd.f32 %v2371_v56, %v2370_v18  ;;  %v2373_v5 = vpop.f32.mrb[18].mxu1  ;;  %v3571_v13 = vadd.f32 %v2421_v48, %v2357_v59  ;;  %v512_v48 = vmul.f32 %v3506_v14, %v3588_v3 }
 0x180   :  { %v2374_v55 = vpop.f32.mrb[19].mxu1 }
 0x181   :  { %v2375_v7 = vadd.f32 %v2374_v55, %v2373_v5  ;;  %v510_v5 = vmul.f32 %v3588_v3, %v3508_v38 }
 0x183   :  { %v2422_v25 = vpop.f32.mrb[24].mxu0 }
 0x184   :  { %v2423_v52 = vpop.f32.mrb[25].mxu0 }
 0x185   :  { %v2424_v27 = vadd.f32 %v2423_v52, %v2422_v25  ;;  %v2425_v57 = vpop.f32.mrb[26].mxu0  ;;  %v2376_v19 = vpop.f32.mrb[20].mxu1 }
 0x186   :  { %v2426_v36 = vpop.f32.mrb[27].mxu0  ;;  %v2377_v9 = vpop.f32.mrb[21].mxu1 }
 0x187   :  { %v2427_v11 = vadd.f32 %v2426_v36, %v2425_v57  ;;  %v3573_v4 = vadd.f32 %v2377_v9, %v2376_v19  ;;  %v2379_v29 = vpop.f32.mrb[22].mxu1  ;;  %v3575_v54 = vadd.f32 %v2424_v27, %v2360_v45 }
 0x188   :  { %v2380_v60 = vpop.f32.mrb[23].mxu1 }
 0x189   :  { %v3577_v34 = vadd.f32 %v2380_v60, %v2379_v29  ;;  %v3579_v59 = vadd.f32 %v2427_v11, %v2363_v43  ;;  %v513_v29 = vmul.f32 %v3588_v3, %v3512_v28  ;;  %v519_v28 = vmul.f32 %v3518_v12, %v3588_v3 }
 0x18b   :  { %v2428_v16 = vpop.f32.mrb[28].mxu0 }
 0x18c   :  { %v2429_v51 = vpop.f32.mrb[29].mxu0 }
 0x18d   :  { %v2430_v2 = vadd.f32 %v2429_v51, %v2428_v16  ;;  %v2431_v41 = vpop.f32.mrb[30].mxu0  ;;  %v2382_v30 = vpop.f32.mrb[24].mxu1 }
 0x18e   :  { %v2432_v46 = vpop.f32.mrb[31].mxu0  ;;  %v2383_v37 = vpop.f32.mrb[25].mxu1 }
 0x18f   :  { %v2433_v61 = vadd.f32 %v2432_v46, %v2431_v41  ;;  %v3581_v15 = vadd.f32 %v2383_v37, %v2382_v30  ;;  %v2385_v31 = vpop.f32.mrb[26].mxu1  ;;  %v3583_v8 = vadd.f32 %v2430_v2, %v2366_v1  ;;  %v3599_v1 = vld [vmem:[%s4042_s4] ss:$0 sm:$0xff]  ;;  %v514_v2 = vmul.f32 %v3588_v3, %v3516_v20 }
 0x190   :  { %v2386_v45 = vpop.f32.mrb[27].mxu1  ;;  %v3612_v19 = vadd.f32 %v3599_v1, %v511_v42  ;;  %v3617_v36 = vadd.f32 %v3599_v1, %v509_v50  ;;  %v3620_v38 = vadd.f32 %v3599_v1, %v512_v48  ;;  %v3635_v51 = vadd.f32 %v3599_v1, %v515_v40  ;;  %v3661_v48 = vld [vmem:[%s4042_s4 + $0x1] ss:$0 sm:$0xff] }
 0x191   :  { %v3590_v43 = vadd.f32 %v2386_v45, %v2385_v31  ;;  %v3592_v0 = vadd.f32 %v2433_v61, %v2369_v10  ;;  %v3646_v61 = vld [vmem:[%s4041_s3 + $0x1] ss:$0 sm:$0xff]  ;;  %v3650_v20 = vadd.f32 %v3599_v1, %v513_v29  ;;  %v517_v45 = vmul.f32 %v3588_v3, %v3520_v32 }
 0x192   :  { %v4055_v16 = vmax.f32 %v3612_v19, 0.0  ;;  %v4057_v41 = vmax.f32 %v3617_v36, 0.0  ;;  %v4054_v30 = vmax.f32 %v3620_v38, 0.0  ;;  %v551_v32 = vmax.f32 %v3635_v51, 0.0 }
 0x193   :  { %v2434_v21 = vpop.f32.mrb[32].mxu0  ;;  %v3682_v40 = vadd.f32 %v3599_v1, %v517_v45 }
 0x194   :  { %v2435_v49 = vpop.f32.mrb[33].mxu0 }
 0x195   :  { %v2436_v18 = vadd.f32 %v2435_v49, %v2434_v21  ;;  %v2437_v56 = vpop.f32.mrb[34].mxu0  ;;  %v2388_v10 = vpop.f32.mrb[28].mxu1  ;;  %v3656_v49 = vadd.f32 %v3599_v1, %v516_v26  ;;  %v549_v26 = vmax.f32 %v3650_v20, 0.0 }
 0x196   :  { %v2438_v55 = vpop.f32.mrb[35].mxu0  ;;  %v2389_v33 = vpop.f32.mrb[29].mxu1 }
 0x197   :  { %v2439_v25 = vadd.f32 %v2438_v55, %v2437_v56  ;;  %v3607_v52 = vadd.f32 %v2389_v33, %v2388_v10  ;;  %v2391_v27 = vpop.f32.mrb[30].mxu1  ;;  %v3609_v57 = vadd.f32 %v2436_v18, %v2372_v35  ;;  %v3627_v35 = vadd.f32 %v3599_v1, %v510_v5 }
 0x198   :  { %v2392_v14 = vpop.f32.mrb[31].mxu1 }
 0x199   :  { %v3622_v9 = vadd.f32 %v2392_v14, %v2391_v27  ;;  %v3624_v11 = vadd.f32 %v2439_v25, %v2375_v7  ;;  %v4056_v31 = vmax.f32 %v3627_v35, 0.0  ;;  %v3674_v25 = vadd.f32 %v3599_v1, %v519_v28 }
 0x19a   :  { %v520_v14 = vmul.f32 %v3522_v39, %v3588_v3  ;;  %v518_v39 = vmul.f32 %v3588_v3, %v3524_v44 }
 0x19b   :  { %v2440_v60 = vpop.f32.mrb[36].mxu0 }
 0x19c   :  { %v2441_v7 = vpop.f32.mrb[37].mxu0  ;;  %v3710_v44 = vadd.f32 %v3599_v1, %v520_v14  ;;  %v3721_v14 = vadd.f32 %v3599_v1, %v518_v39 }
 0x19d   :  { %v2442_v46 = vadd.f32 %v2441_v7, %v2440_v60  ;;  %v2443_v37 = vpop.f32.mrb[38].mxu0  ;;  %v2523_v53 = vpop.f32.mrb[32].mxu1  ;;  %v552_v60 = vmax.f32 %v3656_v49, 0.0 }
 0x19e   :  { %v2444_v21 = vpop.f32.mrb[39].mxu0  ;;  %v1590_v42 = vadd.f32 %v2523_v53, %v3569_v23  ;;  %v1581_v12 = vpop.f32.mrb[33].mxu1  ;;  %v3669_v23 = vadd.f32 %v3599_v1, %v514_v2  ;;  %v555_v53 = vmax.f32 %v3674_v25, 0.0 }
 0x19f   :  { %v2445_v50 = vadd.f32 %v2444_v21, %v2443_v37  ;;  %v1582_v18 = vadd.f32 %v1581_v12, %v3565_v62  ;;  %v2524_v56 = vpop.f32.mrb[34].mxu1  ;;  %v3665_v10 = vadd.f32 %v2442_v46, %v3573_v4 }
 0x1a0   :  { %v1652_v5 = vmul.f32 %v3646_v61, %v1590_v42  ;;  %v1593_v55 = vadd.f32 %v2524_v56, %v3571_v13  ;;  %v1584_v33 = vpop.f32.mrb[35].mxu1  ;;  %v550_v7 = vmax.f32 %v3669_v23, 0.0 }
 0x1a1   :  { %v1650_v27 = vmul.f32 %v3646_v61, %v1582_v18  ;;  %v1585_v62 = vadd.f32 %v1584_v33, %v3567_v63  ;;  %v3679_v4 = vadd.f32 %v2445_v50, %v3577_v34  ;;  %v553_v18 = vmax.f32 %v3682_v40, 0.0 }
 0x1a2   :  { %v3687_v29 = vadd.f32 %v3661_v48, %v1652_v5  ;;  %v1653_v13 = vmul.f32 %v3646_v61, %v1593_v55 }
 0x1a3   :  { %v2446_v2 = vpop.f32.mrb[40].mxu0  ;;  %v3693_v63 = vadd.f32 %v3661_v48, %v1650_v27  ;;  %v1651_v34 = vmul.f32 %v3646_v61, %v1585_v62 }
 0x1a4   :  { %v4051_v28 = vmax.f32 %v3687_v29, 0.0  ;;  %v2447_v46 = vpop.f32.mrb[41].mxu0  ;;  %v3701_v37 = vadd.f32 %v3661_v48, %v1653_v13 }
 0x1a5   :  { %v2448_v45 = vadd.f32 %v2447_v46, %v2446_v2  ;;  %v4052_v21 = vmax.f32 %v3693_v63, 0.0  ;;  %v2449_v42 = vpop.f32.mrb[42].mxu0  ;;  %v3706_v12 = vadd.f32 %v3661_v48, %v1651_v34  ;;  %v2527_v50 = vpop.f32.mrb[36].mxu1 }
 0x1a6   :  { %v4050_v56 = vmax.f32 %v3701_v37, 0.0  ;;  %v2450_v5 = vpop.f32.mrb[43].mxu0  ;;  %v1606_v55 = vadd.f32 %v2527_v50, %v3583_v8  ;;  %v1597_v33 = vpop.f32.mrb[37].mxu1  ;;  %v1704_v8 = vadd.f32 %v4051_v28, %v4055_v16 }
 0x1a7   :  { %v1702_v27 = vadd.f32 %v4052_v21, %v4057_v41  ;;  %v2451_v62 = vadd.f32 %v2450_v5, %v2449_v42  ;;  %v4053_v13 = vmax.f32 %v3706_v12, 0.0  ;;  %v1598_v2 = vadd.f32 %v1597_v33, %v3575_v54  ;;  %v2528_v34 = vpop.f32.mrb[38].mxu1 }
 0x1a8   :  { %v1656_v46 = vmul.f32 %v3646_v61, %v1606_v55  ;;  %v1609_v50 = vadd.f32 %v2528_v34, %v3592_v0  ;;  %v1600_v47 = vpop.f32.mrb[39].mxu1  ;;  %v1705_v42 = vadd.f32 %v4050_v56, %v4054_v30  ;;  %v1533_v34 = vadd.f32 %v2448_v45, %v3581_v15 }
 0x1a9   :  { %v1703_v54 = vadd.f32 %v4053_v13, %v4056_v31  ;;  %v1654_v39 = vmul.f32 %v3646_v61, %v1598_v2  ;;  %v1601_v5 = vadd.f32 %v1600_v47, %v3579_v59  ;;  %v1718_v33 = vsel %vm333_vm0, %v1702_v27, 0.0 }
 0x1aa   :  { %v3741_v55 = vadd.f32 %v3661_v48, %v1656_v46  ;;  %v1657_v0 = vmul.f32 %v3646_v61, %v1609_v50  ;;  %v3751_v2 = vadd.f32 %v2451_v62, %v3590_v43  ;;  %v556_v47 = vmax.f32 %v3710_v44, 0.0 }
 0x1ab   :  { %v1719_v56 = vsel %vm333_vm0, %v1703_v54, 0.0  ;;  %v2452_v28 = vpop.f32.mrb[44].mxu0  ;;  %v3747_v21 = vadd.f32 %v3661_v48, %v1654_v39  ;;  %v1655_v13 = vmul.f32 %v3646_v61, %v1601_v5  ;;  %v554_v59 = vmax.f32 %v3721_v14, 0.0 }
 0x1ac   :  { %v1720_v27 = vadd.f32 %v1719_v56, %v1718_v33  ;;  %v2453_v46 = vpop.f32.mrb[45].mxu0  ;;  %v3756_v50 = vadd.f32 %v3661_v48, %v1657_v0  ;;  %v1721_v15 = vsel %vm333_vm0, %v1704_v8, 0.0  ;;  %v1723_v62 = vsel %vm333_vm0, %v1705_v42, 0.0 }
 0x1ad   :  { %v2454_v45 = vadd.f32 %v2453_v46, %v2452_v28  ;;  %v4067_v54 = vmax.f32 %v3747_v21, 0.0  ;;  %v2455_v39 = vpop.f32.mrb[46].mxu0  ;;  %v3761_v5 = vadd.f32 %v3661_v48, %v1655_v13  ;;  %v2531_v43 = vpop.f32.mrb[40].mxu1  ;;  %v4066_v16 = vmax.f32 %v3741_v55, 0.0 }
 0x1ae   :  { %v1722_v30 = vadd.f32 %v1721_v15, %v1720_v27  ;;  %v2456_v56 = vpop.f32.mrb[47].mxu0  ;;  %v1622_v33 = vadd.f32 %v2531_v43, %v3665_v10  ;;  %v1613_v0 = vpop.f32.mrb[41].mxu1  ;;  %v523_v42 = vmul.f32 %v3534_v58, %v3588_v3  ;;  %v4064_v15 = vmax.f32 %v3756_v50, 0.0 }
 0x1af   :  { %v1706_v28 = vadd.f32 %v4067_v54, %v549_v26  ;;  %v2457_v8 = vadd.f32 %v2456_v56, %v2455_v39  ;;  %v4058_v46 = vmax.f32 %v3761_v5, 0.0  ;;  %v1614_v13 = vadd.f32 %v1613_v0, %v3609_v57  ;;  %v2532_v31 = vpop.f32.mrb[42].mxu1 }
 0x1b0   :  { %v1724_v27 = vadd.f32 %v1723_v62, %v1722_v30  ;;  %v1660_v10 = vmul.f32 %v3646_v61, %v1622_v33  ;;  %v1616_v43 = vpop.f32.mrb[43].mxu1  ;;  %v1625_v57 = vadd.f32 %v2532_v31, %v3679_v4  ;;  %v1708_v58 = vadd.f32 %v4066_v16, %v551_v32 }
 0x1b1   :  { %v1725_v41 = vsel %vm333_vm0, %v1706_v28, 0.0  ;;  %v1707_v39 = vadd.f32 %v4058_v46, %v550_v7  ;;  %v1658_v56 = vmul.f32 %v3646_v61, %v1614_v13  ;;  %v1617_v33 = vadd.f32 %v1616_v43, %v3624_v11 }
 0x1b2   :  { %v1726_v30 = vadd.f32 %v1725_v41, %v1724_v27  ;;  %v3788_v62 = vadd.f32 %v3661_v48, %v1660_v10  ;;  %v1661_v13 = vmul.f32 %v3646_v61, %v1625_v57  ;;  %v1541_v31 = vadd.f32 %v2454_v45, %v3607_v52 }
 0x1b3   :  { %v1727_v0 = vsel %vm333_vm0, %v1707_v39, 0.0  ;;  %v3793_v28 = vadd.f32 %v3661_v48, %v1658_v56  ;;  %v521_v4 = vmul.f32 %v3588_v3, %v3536_v17  ;;  %v1659_v41 = vmul.f32 %v3646_v61, %v1617_v33 }
 0x1b4   :  { %v1728_v46 = vadd.f32 %v1727_v0, %v1726_v30  ;;  %v1544_v27 = vadd.f32 %v2457_v8, %v3622_v9  ;;  %v3802_v10 = vadd.f32 %v3599_v1, %v523_v42  ;;  %v1709_v11 = vadd.f32 %v4064_v15, %v552_v60 }
 0x1b5   :  { %v4063_v43 = vmax.f32 %v3793_v28, 0.0  ;;  %v3810_v52 = vadd.f32 %v3661_v48, %v1661_v13  ;;  %v2535_v45 = vpop.f32.mrb[44].mxu1  ;;  %v1729_v17 = vsel %vm333_vm0, %v1708_v58, 0.0  ;;  %v4059_v39 = vmax.f32 %v3788_v62, 0.0 }
 0x1b6   :  { %v3815_v9 = vadd.f32 %v3661_v48, %v1659_v41  ;;  %v1638_v8 = vadd.f32 %v2535_v45, %v1541_v31  ;;  %v1629_v42 = vpop.f32.mrb[45].mxu1  ;;  %v524_v56 = vmul.f32 %v3538_v24, %v3588_v3  ;;  %v522_v57 = vmul.f32 %v3588_v3, %v3540_v22 }
 0x1b7   :  { %v1730_v30 = vadd.f32 %v1729_v17, %v1728_v46  ;;  %v1630_v33 = vadd.f32 %v1629_v42, %v1533_v34  ;;  %v2536_v0 = vpop.f32.mrb[46].mxu1  ;;  %v1710_v58 = vadd.f32 %v4063_v43, %v553_v18  ;;  %v4060_v13 = vmax.f32 %v3810_v52, 0.0 }
 0x1b8   :  { %v4062_v41 = vmax.f32 %v3815_v9, 0.0  ;;  %v1664_v31 = vmul.f32 %v3646_v61, %v1638_v8  ;;  %v1632_v45 = vpop.f32.mrb[47].mxu1  ;;  %v3829_v24 = vadd.f32 %v3599_v1, %v521_v4  ;;  %v1731_v22 = vsel %vm333_vm0, %v1709_v11, 0.0 }
 0x1b9   :  { %v1662_v3 = vmul.f32 %v3646_v61, %v1630_v33  ;;  %v1641_v34 = vadd.f32 %v2536_v0, %v1544_v27  ;;  %v1712_v46 = vadd.f32 %v4059_v39, %v555_v53  ;;  %v1633_v4 = vadd.f32 %v1632_v45, %v3751_v2 }
 0x1ba   :  { %v1711_v17 = vadd.f32 %v4062_v41, %v554_v59  ;;  %v3842_v8 = vadd.f32 %v3661_v48, %v1664_v31  ;;  %v3846_v11 = vadd.f32 %v3599_v1, %v522_v57  ;;  %v1732_v42 = vadd.f32 %v1731_v22, %v1730_v30 }
 0x1bb   :  { %v3849_v27 = vadd.f32 %v3661_v48, %v1662_v3  ;;  %v1665_v33 = vmul.f32 %v3646_v61, %v1641_v34  ;;  %v1739_v0 = vsel %vm333_vm0, %v1710_v58, 0.0  ;;  %v1713_v39 = vadd.f32 %v4060_v13, %v556_v47 }
 0x1bc   :  { %v1740_v31 = vsel %vm333_vm0, %v1711_v17, 0.0  ;;  %v1663_v2 = vmul.f32 %v3646_v61, %v1633_v4  ;;  %v557_v57 = vmax.f32 %v3829_v24, 0.0  ;;  %v3865_v3 = vadd.f32 %v3599_v1, %v524_v56 }
 0x1bd   :  { %v1741_v45 = vadd.f32 %v1740_v31, %v1739_v0  ;;  %v4061_v30 = vmax.f32 %v3849_v27, 0.0  ;;  %v3862_v22 = vadd.f32 %v3661_v48, %v1665_v33  ;;  %v1742_v58 = vsel %vm333_vm0, %v1712_v46, 0.0 }
 0x1be   :  { %v4065_v34 = vmax.f32 %v3842_v8, 0.0  ;;  %v3870_v13 = vadd.f32 %v3661_v48, %v1663_v2  ;;  %v4068_v61 = vmax.f32 %v3802_v10, 0.0  ;;  %v1733_v17 = vrot.slane %v1732_v42, 4 }
 0x1bf   :  { %v1743_v4 = vadd.f32 %v1742_v58, %v1741_v45  ;;  %v1714_v33 = vadd.f32 %v4061_v30, %v557_v57  ;;  %v4070_v0 = vmax.f32 %v3846_v11, 0.0  ;;  %v1744_v1 = vsel %vm333_vm0, %v1713_v39, 0.0 }
 0x1c0   :  { %v4071_v56 = vmax.f32 %v3862_v22, 0.0  ;;  %v4069_v46 = vmax.f32 %v3870_v13, 0.0  ;;  %v4072_v2 = vmax.f32 %v3865_v3, 0.0  ;;  %v1716_v45 = vadd.f32 %v4065_v34, %v4068_v61 }
 0x1c1   :  { %v1745_v31 = vadd.f32 %v1744_v1, %v1743_v4  ;;  %v1746_v48 = vsel %vm333_vm0, %v1714_v33, 0.0  ;;  %v1734_v39 = vadd.f32 %v1733_v17, %v1732_v42  ;;  %v4082_v51 = vmax.f32 %v3846_v11, 0.0 }
 0x1c2   :  { %v1715_v58 = vadd.f32 %v4069_v46, %v4070_v0  ;;  %v1717_v4 = vadd.f32 %v4071_v56, %v4072_v2  ;;  %v1750_v41 = vsel %vm333_vm0, %v1716_v45, 0.0  ;;  %v4083_v49 = vmax.f32 %v3802_v10, 0.0 }
 0x1c3   :  { %v1747_v30 = vadd.f32 %v1746_v48, %v1745_v31  ;;  %v1735_v15 = vrot.slane %v1734_v39, 2  ;;  %v4084_v40 = vmax.f32 %v3865_v3, 0.0  ;;  %v4087_v14 = vmax.f32 %v3687_v29, 0.0 }
 0x1c4   :  { %v1748_v33 = vsel %vm333_vm0, %v1715_v58, 0.0  ;;  %v1752_v34 = vsel %vm333_vm0, %v1717_v4, 0.0  ;;  %v1854_v58 = vld [vmem:[%s4045_s7] sm:$0xff]  ;;  %v4089_v11 = vmax.f32 %v3747_v21, 0.0  ;;  %v4094_v29 = vmax.f32 %v3815_v9, 0.0 }
 0x1c5   :  { %v1749_v1 = vadd.f32 %v1748_v33, %v1747_v30  ;;  %v1736_v61 = vadd.f32 %v1735_v15, %v1734_v39  ;;  %v2313_v39 = vld [vmem:[%s4045_s7 + $0x28] sm:$0xff]  ;;  %v2308_v4 = vld [vmem:[%s4044_s6] ss:$0 sm:$0xff]  ;;  %v4096_v21 = vmax.f32 %v3810_v52, 0.0 }
 0x1c7   :  { %v1751_v43 = vadd.f32 %v1750_v41, %v1749_v1  ;;  %v1737_v42 = vrot.slane %v1736_v61, 1  ;;  %v1855_v41 = vld [vmem:[%s4045_s7 + $0x8] sm:$0xff] }
 0x1c9   :  { %v1753_v16 = vadd.f32 %v1752_v34, %v1751_v43  ;;  %v1738_v48 = vadd.f32 %v1737_v42, %v1736_v61  ;;  %v2591_v34 = vpack.c.bf16 %v1855_v41, %v1854_v58 }
 0x1cb   :  { %v1754_v54 = vrot.slane %v1753_v16, 4  ;;  %v1761_v45 = vmul.f32 0.015625, %v1738_v48  ;;  %v2315_v48 = vld [vmem:[%s4045_s7 + $0x38] sm:$0xff] }
 0x1cd   :  { %v1755_v46 = vadd.f32 %v1754_v54, %v1753_v16  ;;  %v1856_v16 = vld [vmem:[%s4045_s7 + $0x10] sm:$0xff]  ;;  %v1857_v54 = vld [vmem:[%s4045_s7 + $0x18] sm:$0xff] }
 0x1ce   :  { %v2594_v61 = vpack.c.bf16 %v1857_v54, %v1856_v16 }
 0x1cf   :  { %v1756_v17 = vrot.slane %v1755_v46, 2 }
 0x1d1   :  { %v1757_v31 = vadd.f32 %v1756_v17, %v1755_v46  ;;  %v2312_v46 = vld [vmem:[%s4045_s7 + $0x20] sm:$0xff] }
 0x1d2   :  { %v2597_v1 = vpack.c.bf16 %v2313_v39, %v2312_v46 }
 0x1d3   :  { %v1758_v0 = vrot.slane %v1757_v31, 1 }
 0x1d5   :  { %v1759_v30 = vadd.f32 %v1758_v0, %v1757_v31  ;;  %v4077_v0 = vmov 0.0|0.0   ;;  %v2314_v31 = vld [vmem:[%s4045_s7 + $0x30] sm:$0xff]  ;;  %s2693_s7 = smov [#allocation3]  }
 0x1d6   :  { %v2600_v58 = vpack.c.bf16 %v2315_v48, %v2314_v31  ;;  %v2031_v31 = vlaneseq }
 0x1d7   :  { %v1762_v43 = vmul.f32 0.015625, %v1759_v30 }
 0x1d9   :  { %v1781_v15 = vsel %vm1780_vm9, %v1762_v43, %v1761_v45  ;;  %v2310_v45 = vld [vmem:[%s4046_s8] ss:$0 sm:$0xff]  ;;  %v2316_v43 = vld [vmem:[%s4046_s8 + $0x1] ss:$0 sm:$0xff]  ;;  %s2163_s8 = sshll.u32 %s2693_s7, 4  ;;  %s4009_s8 = int_to_ptr.vmem [resolvable:$true] %s2163_s8 }
 0x1da   :  { %2554 = vmatmul.mubr.msk.f32.vlgmr.msra.gmra.mrb[48].mxu0 %vm333_vm0, %v1781_v15  ;;  %s2664_s0 = scalar_lea.vmem %s4009_s8, 2048  ;;  %p2669_p1 = scmp.lt.s32.totalorder %s4009_s8, %s4009_s8 }
 0x1db   :  { %2592 = vmatpush3.bf16.msra.mxu0 %v2591_v34  ;;  %2564 = vmatprep.mubr.msk.f32.mxu0 %vm2690_vm8, %v2691_v6  ;;  %p2665_p0 = scmp.ne.s32.totalorder %s4009_s8, %s2664_s0  ;;  %p2670_p2 = scmp.lt.s32.totalorder %s2664_s0, %s2664_s0 }
 0x1dc   :  { %2593 = vmatprep.subr.bf16.mxu0 %v4077_v0 }
 0x1dd   :  { %p2671_p3 = por %p2670_p2, %p2669_p1 }
 0x1df   :  { %2595 = vmatpush3.bf16.msra.mxu0 %v2594_v61  ;;  %p2672_p4 = pnand %p2671_p3, %p2665_p0 }
 0x1e0   :  { %2596 = vmatprep.subr.bf16.mxu0 %v4077_v0 }
 0x2ad   :  { %v1850_v33 = vpop.f32.mrb[48].mxu0 }
 0x2ae   :  { %v1851_v42 = vadd.f32 %v2308_v4, %v1850_v33  ;;  %v2555_v17 = vpop.f32.mrb[49].mxu0 }
 0x2b0   :  { %2565 = vmatmul.mubr.msk.f32.vlgmr.msra.gmra.mrb[50].mxu0 %vm1863_vm10, %v1851_v42 }
 0x2b1   :  { %2598 = vmatpush3.bf16.msra.mxu0 %v2597_v1  ;;  %2575 = vmatprep.mubr.msk.f32.mxu0 %vm2690_vm8, %v2691_v6 }
 0x2b2   :  { %2599 = vmatprep.subr.bf16.mxu0 %v4077_v0 }
 0x2b5   :  { %2601 = vmatpush3.bf16.msra.mxu0 %v2600_v58  ;;  %v2032_v58 = vshrl.u32 %v2031_v31, 7  ;;  %v4079_v31 = vmax.f32 %v3627_v35, 0.0 }
 0x2b8   :  { %2576 = vmatmul.mubr.msk.f32.vlgmr.msra.gmra.mrb[52].mxu0 %vm1863_vm10, %v1851_v42  ;;  %v2692_v42 = vmov 1966171168  }
 0x2b9   :  { %v2029_v17 = vunpack.c.l.s4 %v2692_v42  ;;  %v4078_v42 = vmax.f32 %v3617_v36, 0.0 }
 0x2bb   :  { %v2030_v48 = vunpack.c.0.s8 %v2029_v17 }
 0x383   :  { %v1933_v41 = vpop.f32.mrb[50].mxu0 }
 0x384   :  { %v2566_v30 = vpop.f32.mrb[51].mxu0  ;;  %v1934_v16 = vadd.f32 %v2310_v45, %v1933_v41 }
 0x385   :  { %v2033_v30 = vsub.s32 %v2030_v48, %v2032_v58 }
 0x38b   :  { %v2013_v34 = vpop.f32.mrb[52].mxu0 }
 0x38c   :  { %v2014_v54 = vadd.f32 %v2316_v43, %v2013_v34  ;;  %v2577_v15 = vpop.f32.mrb[53].mxu0 }
 0x38e   :  { %v2017_v61 = vmax.f32 %v1934_v16, %v2014_v54 }
 0x390   :  { %v2018_v6 = vsub.f32 %v1934_v16, %v2017_v61  ;;  %v2021_v46 = vsub.f32 %v2014_v54, %v2017_v61  ;;  %v2052_v16 = vsub.s32 0, %v2032_v58  ;;  %v4081_v58 = vmax.f32 %v3620_v38, 0.0 }
 0x392   :  { %v2019_v0 = vmul.f32 1.442695, %v2018_v6  ;;  %v2022_v39 = vmul.f32 1.442695, %v2021_v46 }
 0x394   :  { %2658 = vpow2.f32 %v2019_v0 }
 0x395   :  { %2660 = vpow2.f32 %v2022_v39 }
 0x39e   :  { %v2659_v4 = vpop.eup %2658 }
 0x39f   :  { %v2661_v33 = vpop.eup %2660 }
 0x3a0   :  { %v2024_v1 = vadd.f32 %v2661_v33, %v2659_v4 }
 0x3a2   :  { %2662 = vrcp.f32 %v2024_v1 }
 0x3ac   :  { %v2663_v41 = vpop.eup %2662 }
 0x3ad   :  { %v2026_v45 = vmul.f32 %v2663_v41, %v2659_v4  ;;  %v2076_v43 = vmul.f32 %v2663_v41, %v2661_v33  ;;  %v4080_v4 = vmax.f32 %v3612_v19, 0.0 }
 0x3af   :  { %v2034_v34 = vrot.slane %v2026_v45, %v2033_v30  ;;  %v2084_v54 = vrot.slane %v2076_v43, %v2033_v30 }
 0x3b1   :  { %v2035_v15 = vcombine.high %v2034_v34, %v2034_v34  ;;  %v2042_v61 = vrot.slane %v2034_v34, %v2033_v30  ;;  %v2085_v6 = vcombine.high %v2084_v54, %v2084_v54  ;;  %v2092_v46 = vrot.slane %v2084_v54, %v2033_v30 }
 0x3b3   :  { %v2049_v0 = vrot.slane %v2035_v15, %v2033_v30  ;;  %v2053_v39 = vrot.slane %v2042_v61, %v2052_v16  ;;  %v2099_v56 = vrot.slane %v2085_v6, %v2033_v30  ;;  %v2103_v1 = vrot.slane %v2092_v46, %v2052_v16 }
 0x3b5   :  { %v2057_v2 = vrot.slane %v2049_v0, %v2052_v16  ;;  %v2060_v17 = vmul.f32 %v2053_v39, %v4078_v42  ;;  %v2061_v48 = vmul.f32 %v2053_v39, %v4079_v31  ;;  %v2062_v33 = vmul.f32 %v2053_v39, %v4080_v4 }
 0x3b6   :  { %v2063_v41 = vmul.f32 %v2053_v39, %v4081_v58  ;;  %v2064_v45 = vmul.f32 %v2053_v39, %v549_v26  ;;  %v2065_v30 = vmul.f32 %v2053_v39, %v550_v7  ;;  %v2066_v43 = vmul.f32 %v2053_v39, %v551_v32 }
 0x3b7   :  { %v2067_v36 = vmul.f32 %v2053_v39, %v552_v60  ;;  %v2068_v35 = vmul.f32 %v2057_v2, %v553_v18  ;;  %v2069_v19 = vmul.f32 %v2057_v2, %v554_v59  ;;  %v2070_v38 = vmul.f32 %v2057_v2, %v555_v53 }
 0x3b8   :  { %v2071_v20 = vmul.f32 %v2057_v2, %v556_v47  ;;  %v2072_v23 = vmul.f32 %v2057_v2, %v557_v57  ;;  %v2073_v32 = vmul.f32 %v2057_v2, %v4082_v51  ;;  %v2074_v26 = vmul.f32 %v2057_v2, %v4083_v49 }
 0x3b9   :  { %v2075_v60 = vmul.f32 %v2057_v2, %v4084_v40  ;;  %v2107_v7 = vrot.slane %v2099_v56, %v2052_v16  ;;  %v4085_v18 = vmax.f32 %v3693_v63, 0.0  ;;  %v4086_v53 = vmax.f32 %v3706_v12, 0.0 }
 0x3ba   :  { %v2112_v47 = vmul.f32 %v2103_v1, %v4087_v14  ;;  %v4088_v59 = vmax.f32 %v3701_v37, 0.0  ;;  %v2114_v10 = vmul.f32 %v2103_v1, %v4089_v11  ;;  %v4090_v57 = vmax.f32 %v3761_v5, 0.0 }
 0x3bb   :  { %v2110_v25 = vmul.f32 %v2103_v1, %v4085_v18  ;;  %v2111_v44 = vmul.f32 %v2103_v1, %v4086_v53  ;;  %v4091_v56 = vmax.f32 %v3741_v55, 0.0  ;;  %v4092_v63 = vmax.f32 %v3756_v50, 0.0 }
 0x3bc   :  { %v2113_v24 = vmul.f32 %v2103_v1, %v4088_v59  ;;  %v2115_v3 = vmul.f32 %v2103_v1, %v4090_v57  ;;  %v4093_v12 = vmax.f32 %v3793_v28, 0.0  ;;  %v2119_v54 = vmul.f32 %v2107_v7, %v4094_v29 }
 0x3bd   :  { %v2116_v2 = vmul.f32 %v2103_v1, %v4091_v56  ;;  %v2117_v34 = vmul.f32 %v2103_v1, %v4092_v63  ;;  %v4095_v37 = vmax.f32 %v3788_v62, 0.0  ;;  %v2121_v61 = vmul.f32 %v2107_v7, %v4096_v21 }
 0x3be   :  { %v2118_v16 = vmul.f32 %v2107_v7, %v4093_v12  ;;  %v4097_v5 = vmax.f32 %v3849_v27, 0.0  ;;  %v4098_v55 = vmax.f32 %v3870_v13, 0.0  ;;  %v4099_v50 = vmax.f32 %v3842_v8, 0.0 }
 0x3bf   :  { %v2120_v15 = vmul.f32 %v2107_v7, %v4095_v37  ;;  %v4100_v28 = vmax.f32 %v3862_v22, 0.0  ;;  %v2126_v9 = vadd.f32 %v2110_v25, %v2060_v17  ;;  %v2127_v1 = vadd.f32 %v2111_v44, %v2061_v48 }
 0x3c0   :  { %v2122_v6 = vmul.f32 %v2107_v7, %v4097_v5  ;;  %v2123_v46 = vmul.f32 %v2107_v7, %v4098_v55  ;;  %v2124_v0 = vmul.f32 %v2107_v7, %v4099_v50  ;;  %v2128_v62 = vadd.f32 %v2112_v47, %v2062_v33 }
 0x3c1   :  { %v2125_v39 = vmul.f32 %v2107_v7, %v4100_v28  ;;  %v2129_v42 = vadd.f32 %v2113_v24, %v2063_v41  ;;  %v2130_v52 = vadd.f32 %v2114_v10, %v2064_v45  ;;  %v2131_v31 = vadd.f32 %v2115_v3, %v2065_v30  ;;  %2142 = vst.msk [vmem:[#allocation3] sm:$0xff] %vm333_vm0, %v2126_v9 }
 0x3c2   :  { %v2132_v4 = vadd.f32 %v2116_v2, %v2066_v43  ;;  %v2133_v27 = vadd.f32 %v2117_v34, %v2067_v36  ;;  %v2134_v58 = vadd.f32 %v2118_v16, %v2068_v35  ;;  %v2135_v51 = vadd.f32 %v2119_v54, %v2069_v19  ;;  %2143 = vst.msk [vmem:[#allocation3 + $0x8] sm:$0xff] %vm333_vm0, %v2127_v1 }
 0x3c3   :  { %v2136_v13 = vadd.f32 %v2120_v15, %v2070_v38  ;;  %v2137_v8 = vadd.f32 %v2121_v61, %v2071_v20  ;;  %v2138_v22 = vadd.f32 %v2122_v6, %v2072_v23  ;;  %v2139_v49 = vadd.f32 %v2123_v46, %v2073_v32  ;;  %2144 = vst.msk [vmem:[#allocation3 + $0x10] sm:$0xff] %vm333_vm0, %v2128_v62 }
 0x3c4   :  { %2145 = vst.msk [vmem:[#allocation3 + $0x18] sm:$0xff] %vm333_vm0, %v2129_v42  ;;  %2146 = vst.msk [vmem:[#allocation3 + $0x20] sm:$0xff] %vm333_vm0, %v2130_v52  ;;  %v2140_v17 = vadd.f32 %v2124_v0, %v2074_v26  ;;  %v2141_v48 = vadd.f32 %v2125_v39, %v2075_v60 }
 0x3c5   :  { %2147 = vst.msk [vmem:[#allocation3 + $0x28] sm:$0xff] %vm333_vm0, %v2131_v31  ;;  %2148 = vst.msk [vmem:[#allocation3 + $0x30] sm:$0xff] %vm333_vm0, %v2132_v4 }
 0x3c6   :  { %2149 = vst.msk [vmem:[#allocation3 + $0x38] sm:$0xff] %vm333_vm0, %v2133_v27  ;;  %2150 = vst.msk [vmem:[#allocation3 + $0x40] sm:$0xff] %vm333_vm0, %v2134_v58 }
 0x3c7   :  { %2151 = vst.msk [vmem:[#allocation3 + $0x48] sm:$0xff] %vm333_vm0, %v2135_v51  ;;  %2152 = vst.msk [vmem:[#allocation3 + $0x50] sm:$0xff] %vm333_vm0, %v2136_v13 }
 0x3c8   :  { %2153 = vst.msk [vmem:[#allocation3 + $0x58] sm:$0xff] %vm333_vm0, %v2137_v8  ;;  %2154 = vst.msk [vmem:[#allocation3 + $0x60] sm:$0xff] %vm333_vm0, %v2138_v22 }
 0x3c9   :  { %2155 = vst.msk [vmem:[#allocation3 + $0x68] sm:$0xff] %vm333_vm0, %v2139_v49  ;;  %2156 = vst.msk [vmem:[#allocation3 + $0x70] sm:$0xff] %vm333_vm0, %v2140_v17 }
 0x3ca   :  { %2157 = vst.msk [vmem:[#allocation3 + $0x78] sm:$0xff] %vm333_vm0, %v2141_v48 }
 0x3cb   :  { %2675 = shalt.err (!%p2672_p4)
}
 0x3cc   :  { %s2676_s17 = scalar_lea.hbm %s4047_s9, 2048 }
 0x3cd   :  { %p2677_p5 = scmp.ne.s32.totalorder %s4047_s9, %s2676_s17  ;;  %p2680_p6 = scmp.lt.u32.totalorder %s2676_s17, %s4047_s9 }
 0x3cf   :  { %p2682_p7 = pnand %p2680_p6, %p2677_p5 }
 0x3d1   :  { %2685 = shalt.err (!%p2682_p7)
}
 0x3d2   :  { %s2694_s20 = smov 128   ;;  %s2695_s2 = smov 8  }
 0x3d3   :  { %2169 = dma.vmem_to_hbm [thread:$0]  %s4009_s8, 2048, %s4047_s9, [#allocation4], %s2694_s20, %s2694_s20, %s2695_s2  }
 0x3d4   :  { %2686 = dma.done.wait [#allocation4], 2048  }
 0x3d5   :  { %2687 = vsyncadd [#allocation4], 4294965248 }
 0x3d6   :  { %2173 = vsyncpa [#allocation4], 1 }

</bundles_post_ra>
